<compile_context>
chip_gen: v5e
topology: v5e:2x2
jax: 0.10.0
libtpu: 0.0.40
codegen_flags: <defaults>
</compile_context>

<pallas_src>
import jax
import jax.numpy as jnp
from jax.experimental import pallas as pl
from jax.experimental.pallas import tpu as pltpu

LATENT_DIM = 40
IN_DIM = 784
H1 = 256
H2 = 64

# lane-dense padding only for the tiny inner layers (do NOT pad them to 256:
# the wasted FLOPs would outweigh half-filling a 256-wide MXU there)
H2_PAD = 128
LAT_PAD = 128


def _round_up(x, m):
    return ((x + m - 1) // m) * m


def _cdiv(a, b):
    return -(-a // b)


def _pick_max_batch_tile():
    """1024 on 128-MiB-VMEM parts (v5e/v6e, 1 TC); 256 otherwise (v7x: 64 MiB, 2 TCs)."""
    try:
        vmem = pltpu.get_tpu_info().vmem_capacity_bytes
        if vmem is not None and vmem >= 100 * 1024 * 1024:
            return 1024
    except Exception:
        pass
    return 256


MAX_BATCH_TILE = _pick_max_batch_tile()
VMEM_LIMIT_BYTES = (48 if MAX_BATCH_TILE >= 1024 else 24) * 1024 * 1024


def _ae_kernel(x_ref,
               w1_ref, b1_ref, w2_ref, b2_ref, w3_ref, b3_ref,
               w4_ref, b4_ref, w5_ref, b5_ref, w6_ref, b6_ref,
               xpred_ref, z_ref):
    bf16 = jnp.bfloat16
    x = x_ref[...].astype(bf16)

    # ---- encoder ---- (bf16 MXU operands, f32 accumulation / epilogues)
    h = jnp.dot(x, w1_ref[...], preferred_element_type=jnp.float32) + b1_ref[...]
    h = jnp.maximum(h, 0.0)
    h = jnp.dot(h.astype(bf16), w2_ref[...], preferred_element_type=jnp.float32) + b2_ref[...]
    h = jnp.maximum(h, 0.0)
    z = jnp.dot(h.astype(bf16), w3_ref[...], preferred_element_type=jnp.float32) + b3_ref[...]
    z_ref[...] = z.astype(z_ref.dtype)

    # ---- decoder ----
    d = jnp.dot(z.astype(bf16), w4_ref[...], preferred_element_type=jnp.float32) + b4_ref[...]
    d = jnp.maximum(d, 0.0)
    d = jnp.dot(d.astype(bf16), w5_ref[...], preferred_element_type=jnp.float32) + b5_ref[...]
    d = jnp.maximum(d, 0.0)
    logits = jnp.dot(d.astype(bf16), w6_ref[...], preferred_element_type=jnp.float32) + b6_ref[...]
    xpred_ref[...] = jax.nn.sigmoid(logits).astype(xpred_ref.dtype)


def _const_spec(shape):
    """Whole-array block, same block index for every grid step (never re-DMA'd)."""
    nd = len(shape)
    idx_map = lambda i, _nd=nd: (0,) * _nd
    try:
        # constant across the grid -> single-buffer: halves weight VMEM + DMA work
        return pl.BlockSpec(shape, idx_map, pipeline_mode=pl.Buffered(1))
    except Exception:
        return pl.BlockSpec(shape, idx_map)


def _pad2(a, rows, cols):
    return jnp.pad(a, ((0, rows - a.shape[0]), (0, cols - a.shape[1])))


@jax.jit
def autoencoder_forward(x, params):
    """x: any shape reshaping to (-1, 784), like torch's x.view(-1, 784)."""
    x2d = jnp.reshape(x, (-1, IN_DIM)).astype(jnp.float32)
    n = x2d.shape[0]

    # balanced batch tiling (minimal zero-row padding, tiles 8-row aligned)
    num_tiles = _cdiv(n, MAX_BATCH_TILE)
    batch_tile = _round_up(_cdiv(n, num_tiles), 8)
    n_pad = num_tiles * batch_tile

    x_p = x2d if n_pad == n else jnp.pad(x2d, ((0, n_pad - n), (0, 0)))

    (w1, b1), (w2, b2), (w3, b3), (w4, b4), (w5, b5), (w6, b6) = params
    # bf16 weights feed the MXU natively (f32 operands force slow multi-pass emulation);
    # zero-padded K/N rows/cols are mathematically inert.
    bf16 = jnp.bfloat16
    w1p = w1.astype(bf16)                          # (784, 256)
    w2p = _pad2(w2, H1, H2_PAD).astype(bf16)       # (256, 128)
    w3p = _pad2(w3, H2_PAD, LAT_PAD).astype(bf16)  # (128, 128)
    w4p = _pad2(w4, LAT_PAD, H2_PAD).astype(bf16)  # (128, 128)
    w5p = _pad2(w5, H2_PAD, H1).astype(bf16)       # (128, 256)
    w6p = w6.astype(bf16)                          # (256, 784)
    b1p = b1                                       # biases stay f32
    b2p = _pad2(b2, 1, H2_PAD)
    b3p = _pad2(b3, 1, LAT_PAD)
    b4p = _pad2(b4, 1, H2_PAD)
    b5p = b5
    b6p = b6

    grid = (num_tiles,)

    in_specs = [
        pl.BlockSpec((batch_tile, IN_DIM), lambda i: (i, 0)),
        _const_spec(w1p.shape), _const_spec(b1p.shape),
        _const_spec(w2p.shape), _const_spec(b2p.shape),
        _const_spec(w3p.shape), _const_spec(b3p.shape),
        _const_spec(w4p.shape), _const_spec(b4p.shape),
        _const_spec(w5p.shape), _const_spec(b5p.shape),
        _const_spec(w6p.shape), _const_spec(b6p.shape),
    ]
    out_specs = [
        pl.BlockSpec((batch_tile, IN_DIM), lambda i: (i, 0)),
        pl.BlockSpec((batch_tile, LAT_PAD), lambda i: (i, 0)),
    ]
    out_shape = [
        jax.ShapeDtypeStruct((n_pad, IN_DIM), jnp.float32),
        jax.ShapeDtypeStruct((n_pad, LAT_PAD), jnp.float32),
    ]

    layer_macs = (IN_DIM * H1 + H1 * H2_PAD + H2_PAD * LAT_PAD
                  + LAT_PAD * H2_PAD + H2_PAD * H1 + H1 * IN_DIM)
    cost = pl.CostEstimate(
        flops=2 * n_pad * layer_macs,
        transcendentals=n_pad * IN_DIM,  # sigmoid over the reconstruction
        bytes_accessed=4 * n_pad * (IN_DIM + IN_DIM + LAT_PAD) + 2 * layer_macs,
    )

    x_pred, z = pl.pallas_call(
        _ae_kernel,
        grid_spec=pltpu.PrefetchScalarGridSpec(
            num_scalar_prefetch=0,
            grid=grid,
            in_specs=in_specs,
            out_specs=out_specs,
        ),
        out_shape=out_shape,
        compiler_params=pltpu.CompilerParams(
            dimension_semantics=("parallel",),
            vmem_limit_bytes=VMEM_LIMIT_BYTES,
        ),
        cost_estimate=cost,
    )(x_p, w1p, b1p, w2p, b2p, w3p, b3p, w4p, b4p, w5p, b5p, w6p, b6p)

    if n_pad != n:
        x_pred = x_pred[:n]
        z = z[:n]
    return x_pred, z[:, :LATENT_DIM]


def init_params(key):
    """Deterministic synthetic weights; layout (in_features, out_features), biases (1, out)."""
    dims = [(IN_DIM, H1), (H1, H2), (H2, LATENT_DIM),
            (LATENT_DIM, H2), (H2, H1), (H1, IN_DIM)]
    params = []
    for (din, dout) in dims:
        key, kw, kb = jax.random.split(key, 3)
        bound = 1.0 / jnp.sqrt(din)  # matches torch.nn.Linear default init scale
        w = jax.random.uniform(kw, (din, dout), jnp.float32, -bound, bound)
        b = jax.random.uniform(kb, (1, dout), jnp.float32, -bound, bound)
        params.append((w, b))
    return tuple(params)


def _reference_forward(x, params):
    """Pure-JAX reference for sanity checking."""
    x2d = jnp.reshape(x, (-1, IN_DIM)).astype(jnp.float32)
    (w1, b1), (w2, b2), (w3, b3), (w4, b4), (w5, b5), (w6, b6) = params
    h = jax.nn.relu(x2d @ w1 + b1)
    h = jax.nn.relu(h @ w2 + b2)
    z = h @ w3 + b3
    d = jax.nn.relu(z @ w4 + b4)
    d = jax.nn.relu(d @ w5 + b5)
    x_pred = jax.nn.sigmoid(d @ w6 + b6)
    return x_pred, z


if __name__ == "__main__":
    key = jax.random.PRNGKey(0)
    key, kx1, kx2 = jax.random.split(key, 3)
    params = init_params(key)

    # Small MNIST-like batch: (batch=8, channels=1, 28, 28) -> view(-1, 784)
    x_small = jax.random.uniform(kx1, (8, 1, 28, 28), jnp.float32)
    x_pred, z = jax.block_until_ready(autoencoder_forward(x_small, params))
    xp_ref, z_ref = _reference_forward(x_small, params)
    assert x_pred.shape == (8, IN_DIM) and z.shape == (8, LATENT_DIM)
    # bf16 MXU operands (f32 accumulation) -> tolerance loosened vs pure-f32
    assert jnp.max(jnp.abs(x_pred - xp_ref)) < 5e-2
    assert jnp.max(jnp.abs(z - z_ref)) < 5e-2

    # Larger batch to exercise the multi-tile grid + balanced batch padding
    x_big = jax.random.uniform(kx2, (600, 784), jnp.float32)
    x_pred_b, z_b = jax.block_until_ready(autoencoder_forward(x_big, params))
    xp_ref_b, z_ref_b = _reference_forward(x_big, params)
    assert x_pred_b.shape == (600, IN_DIM) and z_b.shape == (600, LATENT_DIM)
    assert jnp.max(jnp.abs(x_pred_b - xp_ref_b)) < 5e-2
    assert jnp.max(jnp.abs(z_b - z_ref_b)) < 5e-2

    print("KERNEL_OK")
</pallas_src>

<mosaic_0001>
module attributes {stable_mosaic.version = 11 : i64} {
  func.func @_ae_kernel(%arg0: i32, %arg1: memref<8x784xf32, #tpu.memory_space<vmem>>, %arg2: memref<784x256xbf16, #tpu.memory_space<vmem>>, %arg3: memref<1x256xf32, #tpu.memory_space<vmem>>, %arg4: memref<256x128xbf16, #tpu.memory_space<vmem>>, %arg5: memref<1x128xf32, #tpu.memory_space<vmem>>, %arg6: memref<128x128xbf16, #tpu.memory_space<vmem>>, %arg7: memref<1x128xf32, #tpu.memory_space<vmem>>, %arg8: memref<128x128xbf16, #tpu.memory_space<vmem>>, %arg9: memref<1x128xf32, #tpu.memory_space<vmem>>, %arg10: memref<128x256xbf16, #tpu.memory_space<vmem>>, %arg11: memref<1x256xf32, #tpu.memory_space<vmem>>, %arg12: memref<256x784xbf16, #tpu.memory_space<vmem>>, %arg13: memref<1x784xf32, #tpu.memory_space<vmem>>, %arg14: memref<8x784xf32, #tpu.memory_space<vmem>>, %arg15: memref<8x128xf32, #tpu.memory_space<vmem>>) attributes {dimension_semantics = [#tpu.dimension_semantics<parallel>], iteration_bounds = array<i64: 1>, scalar_prefetch = 0 : i64, scratch_operands = 0 : i64, tpu.core_type = #tpu.core_type<tc>, window_params = [{transform_indices = @transform_0, window_bounds = array<i64: 8, 784>}, {pipeline_mode = #tpu.pipeline_mode<synchronous>, transform_indices = @transform_1, window_bounds = array<i64: 784, 256>}, {pipeline_mode = #tpu.pipeline_mode<synchronous>, transform_indices = @transform_2, window_bounds = array<i64: 1, 256>}, {pipeline_mode = #tpu.pipeline_mode<synchronous>, transform_indices = @transform_3, window_bounds = array<i64: 256, 128>}, {pipeline_mode = #tpu.pipeline_mode<synchronous>, transform_indices = @transform_4, window_bounds = array<i64: 1, 128>}, {pipeline_mode = #tpu.pipeline_mode<synchronous>, transform_indices = @transform_5, window_bounds = array<i64: 128, 128>}, {pipeline_mode = #tpu.pipeline_mode<synchronous>, transform_indices = @transform_6, window_bounds = array<i64: 1, 128>}, {pipeline_mode = #tpu.pipeline_mode<synchronous>, transform_indices = @transform_7, window_bounds = array<i64: 128, 128>}, {pipeline_mode = #tpu.pipeline_mode<synchronous>, transform_indices = @transform_8, window_bounds = array<i64: 1, 128>}, {pipeline_mode = #tpu.pipeline_mode<synchronous>, transform_indices = @transform_9, window_bounds = array<i64: 128, 256>}, {pipeline_mode = #tpu.pipeline_mode<synchronous>, transform_indices = @transform_10, window_bounds = array<i64: 1, 256>}, {pipeline_mode = #tpu.pipeline_mode<synchronous>, transform_indices = @transform_11, window_bounds = array<i64: 256, 784>}, {pipeline_mode = #tpu.pipeline_mode<synchronous>, transform_indices = @transform_12, window_bounds = array<i64: 1, 784>}, {transform_indices = @transform_13, window_bounds = array<i64: 8, 784>}, {transform_indices = @transform_14, window_bounds = array<i64: 8, 128>}]} {
    %c0 = arith.constant 0 : index
    %c0_0 = arith.constant 0 : index
    %0 = vector.load %arg1[%c0, %c0_0] : memref<8x784xf32, #tpu.memory_space<vmem>>, vector<8x784xf32>
    %1 = arith.truncf %0 : vector<8x784xf32> to vector<8x784xbf16>
    %c0_1 = arith.constant 0 : index
    %c0_2 = arith.constant 0 : index
    %2 = vector.load %arg2[%c0_1, %c0_2] : memref<784x256xbf16, #tpu.memory_space<vmem>>, vector<784x256xbf16>
    %cst = arith.constant dense<0.000000e+00> : vector<8x256xf32>
    %3 = tpu.matmul %1, %2, %cst {dimension_numbers = #tpu.dot_dimension_numbers<[1], [0], [0], [1], [0, 0, 1, 1], [], []>} : vector<8x784xbf16>, vector<784x256xbf16>, vector<8x256xf32> -> vector<8x256xf32>
    %c0_3 = arith.constant 0 : index
    %c0_4 = arith.constant 0 : index
    %4 = vector.load %arg3[%c0_3, %c0_4] : memref<1x256xf32, #tpu.memory_space<vmem>>, vector<1x256xf32>
    %5 = vector.broadcast %4 : vector<1x256xf32> to vector<8x256xf32>
    %6 = arith.addf %3, %5 : vector<8x256xf32>
    %cst_5 = arith.constant 0.000000e+00 : f32
    %7 = vector.broadcast %cst_5 : f32 to vector<8x256xf32>
    %8 = arith.maximumf %6, %7 : vector<8x256xf32>
    %9 = arith.truncf %8 : vector<8x256xf32> to vector<8x256xbf16>
    %c0_6 = arith.constant 0 : index
    %c0_7 = arith.constant 0 : index
    %10 = vector.load %arg4[%c0_6, %c0_7] : memref<256x128xbf16, #tpu.memory_space<vmem>>, vector<256x128xbf16>
    %cst_8 = arith.constant dense<0.000000e+00> : vector<8x128xf32>
    %11 = tpu.matmul %9, %10, %cst_8 {dimension_numbers = #tpu.dot_dimension_numbers<[1], [0], [0], [1], [0, 0, 1, 1], [], []>} : vector<8x256xbf16>, vector<256x128xbf16>, vector<8x128xf32> -> vector<8x128xf32>
    %c0_9 = arith.constant 0 : index
    %c0_10 = arith.constant 0 : index
    %12 = vector.load %arg5[%c0_9, %c0_10] : memref<1x128xf32, #tpu.memory_space<vmem>>, vector<1x128xf32>
    %13 = vector.broadcast %12 : vector<1x128xf32> to vector<8x128xf32>
    %14 = arith.addf %11, %13 : vector<8x128xf32>
    %cst_11 = arith.constant 0.000000e+00 : f32
    %15 = vector.broadcast %cst_11 : f32 to vector<8x128xf32>
    %16 = arith.maximumf %14, %15 : vector<8x128xf32>
    %17 = arith.truncf %16 : vector<8x128xf32> to vector<8x128xbf16>
    %c0_12 = arith.constant 0 : index
    %c0_13 = arith.constant 0 : index
    %18 = vector.load %arg6[%c0_12, %c0_13] : memref<128x128xbf16, #tpu.memory_space<vmem>>, vector<128x128xbf16>
    %cst_14 = arith.constant dense<0.000000e+00> : vector<8x128xf32>
    %19 = tpu.matmul %17, %18, %cst_14 {dimension_numbers = #tpu.dot_dimension_numbers<[1], [0], [0], [1], [0, 0, 1, 1], [], []>} : vector<8x128xbf16>, vector<128x128xbf16>, vector<8x128xf32> -> vector<8x128xf32>
    %c0_15 = arith.constant 0 : index
    %c0_16 = arith.constant 0 : index
    %20 = vector.load %arg7[%c0_15, %c0_16] : memref<1x128xf32, #tpu.memory_space<vmem>>, vector<1x128xf32>
    %21 = vector.broadcast %20 : vector<1x128xf32> to vector<8x128xf32>
    %22 = arith.addf %19, %21 : vector<8x128xf32>
    %c0_17 = arith.constant 0 : index
    %c0_18 = arith.constant 0 : index
    %23 = vector.load %arg15[%c0_17, %c0_18] : memref<8x128xf32, #tpu.memory_space<vmem>>, vector<8x128xf32>
    tpu.vector_store %arg15[%c0_17, %c0_18], %22 {strides = array<i32>} : memref<8x128xf32, #tpu.memory_space<vmem>>, vector<8x128xf32>,
    %24 = arith.truncf %22 : vector<8x128xf32> to vector<8x128xbf16>
    %c0_19 = arith.constant 0 : index
    %c0_20 = arith.constant 0 : index
    %25 = vector.load %arg8[%c0_19, %c0_20] : memref<128x128xbf16, #tpu.memory_space<vmem>>, vector<128x128xbf16>
    %cst_21 = arith.constant dense<0.000000e+00> : vector<8x128xf32>
    %26 = tpu.matmul %24, %25, %cst_21 {dimension_numbers = #tpu.dot_dimension_numbers<[1], [0], [0], [1], [0, 0, 1, 1], [], []>} : vector<8x128xbf16>, vector<128x128xbf16>, vector<8x128xf32> -> vector<8x128xf32>
    %c0_22 = arith.constant 0 : index
    %c0_23 = arith.constant 0 : index
    %27 = vector.load %arg9[%c0_22, %c0_23] : memref<1x128xf32, #tpu.memory_space<vmem>>, vector<1x128xf32>
    %28 = vector.broadcast %27 : vector<1x128xf32> to vector<8x128xf32>
    %29 = arith.addf %26, %28 : vector<8x128xf32>
    %cst_24 = arith.constant 0.000000e+00 : f32
    %30 = vector.broadcast %cst_24 : f32 to vector<8x128xf32>
    %31 = arith.maximumf %29, %30 : vector<8x128xf32>
    %32 = arith.truncf %31 : vector<8x128xf32> to vector<8x128xbf16>
    %c0_25 = arith.constant 0 : index
    %c0_26 = arith.constant 0 : index
    %33 = vector.load %arg10[%c0_25, %c0_26] : memref<128x256xbf16, #tpu.memory_space<vmem>>, vector<128x256xbf16>
    %cst_27 = arith.constant dense<0.000000e+00> : vector<8x256xf32>
    %34 = tpu.matmul %32, %33, %cst_27 {dimension_numbers = #tpu.dot_dimension_numbers<[1], [0], [0], [1], [0, 0, 1, 1], [], []>} : vector<8x128xbf16>, vector<128x256xbf16>, vector<8x256xf32> -> vector<8x256xf32>
    %c0_28 = arith.constant 0 : index
    %c0_29 = arith.constant 0 : index
    %35 = vector.load %arg11[%c0_28, %c0_29] : memref<1x256xf32, #tpu.memory_space<vmem>>, vector<1x256xf32>
    %36 = vector.broadcast %35 : vector<1x256xf32> to vector<8x256xf32>
    %37 = arith.addf %34, %36 : vector<8x256xf32>
    %cst_30 = arith.constant 0.000000e+00 : f32
    %38 = vector.broadcast %cst_30 : f32 to vector<8x256xf32>
    %39 = arith.maximumf %37, %38 : vector<8x256xf32>
    %40 = arith.truncf %39 : vector<8x256xf32> to vector<8x256xbf16>
    %c0_31 = arith.constant 0 : index
    %c0_32 = arith.constant 0 : index
    %41 = vector.load %arg12[%c0_31, %c0_32] : memref<256x784xbf16, #tpu.memory_space<vmem>>, vector<256x784xbf16>
    %cst_33 = arith.constant dense<0.000000e+00> : vector<8x784xf32>
    %42 = tpu.matmul %40, %41, %cst_33 {dimension_numbers = #tpu.dot_dimension_numbers<[1], [0], [0], [1], [0, 0, 1, 1], [], []>} : vector<8x256xbf16>, vector<256x784xbf16>, vector<8x784xf32> -> vector<8x784xf32>
    %c0_34 = arith.constant 0 : index
    %c0_35 = arith.constant 0 : index
    %43 = vector.load %arg13[%c0_34, %c0_35] : memref<1x784xf32, #tpu.memory_space<vmem>>, vector<1x784xf32>
    %44 = vector.broadcast %43 : vector<1x784xf32> to vector<8x784xf32>
    %45 = arith.addf %42, %44 : vector<8x784xf32>
    %46 = arith.negf %45 : vector<8x784xf32>
    %47 = math.exp %46 : vector<8x784xf32>
    %cst_36 = arith.constant 1.000000e+00 : f32
    %48 = vector.broadcast %cst_36 : f32 to vector<8x784xf32>
    %49 = arith.addf %48, %47 : vector<8x784xf32>
    %50 = arith.divf %48, %49 : vector<8x784xf32>
    %c0_37 = arith.constant 0 : index
    %c0_38 = arith.constant 0 : index
    %51 = vector.load %arg14[%c0_37, %c0_38] : memref<8x784xf32, #tpu.memory_space<vmem>>, vector<8x784xf32>
    tpu.vector_store %arg14[%c0_37, %c0_38], %50 {strides = array<i32>} : memref<8x784xf32, #tpu.memory_space<vmem>>, vector<8x784xf32>,
    return
  }
  func.func @transform_0(%arg0: i32) -> (i32, i32) {
    %c0_i32 = arith.constant 0 : i32
    %c0_i32_0 = arith.constant 0 : i32
    return %arg0, %c0_i32 : i32, i32
  }
  func.func @transform_1(%arg0: i32) -> (i32, i32) {
    %c0_i32 = arith.constant 0 : i32
    %c0_i32_0 = arith.constant 0 : i32
    %c0_i32_1 = arith.constant 0 : i32
    return %c0_i32, %c0_i32_0 : i32, i32
  }
  func.func @transform_2(%arg0: i32) -> (i32, i32) {
    %c0_i32 = arith.constant 0 : i32
    %c0_i32_0 = arith.constant 0 : i32
    %c0_i32_1 = arith.constant 0 : i32
    return %c0_i32, %c0_i32_0 : i32, i32
  }
  func.func @transform_3(%arg0: i32) -> (i32, i32) {
    %c0_i32 = arith.constant 0 : i32
    %c0_i32_0 = arith.constant 0 : i32
    %c0_i32_1 = arith.constant 0 : i32
    return %c0_i32, %c0_i32_0 : i32, i32
  }
  func.func @transform_4(%arg0: i32) -> (i32, i32) {
    %c0_i32 = arith.constant 0 : i32
    %c0_i32_0 = arith.constant 0 : i32
    %c0_i32_1 = arith.constant 0 : i32
    return %c0_i32, %c0_i32_0 : i32, i32
  }
  func.func @transform_5(%arg0: i32) -> (i32, i32) {
    %c0_i32 = arith.constant 0 : i32
    %c0_i32_0 = arith.constant 0 : i32
    %c0_i32_1 = arith.constant 0 : i32
    return %c0_i32, %c0_i32_0 : i32, i32
  }
  func.func @transform_6(%arg0: i32) -> (i32, i32) {
    %c0_i32 = arith.constant 0 : i32
    %c0_i32_0 = arith.constant 0 : i32
    %c0_i32_1 = arith.constant 0 : i32
    return %c0_i32, %c0_i32_0 : i32, i32
  }
  func.func @transform_7(%arg0: i32) -> (i32, i32) {
    %c0_i32 = arith.constant 0 : i32
    %c0_i32_0 = arith.constant 0 : i32
    %c0_i32_1 = arith.constant 0 : i32
    return %c0_i32, %c0_i32_0 : i32, i32
  }
  func.func @transform_8(%arg0: i32) -> (i32, i32) {
    %c0_i32 = arith.constant 0 : i32
    %c0_i32_0 = arith.constant 0 : i32
    %c0_i32_1 = arith.constant 0 : i32
    return %c0_i32, %c0_i32_0 : i32, i32
  }
  func.func @transform_9(%arg0: i32) -> (i32, i32) {
    %c0_i32 = arith.constant 0 : i32
    %c0_i32_0 = arith.constant 0 : i32
    %c0_i32_1 = arith.constant 0 : i32
    return %c0_i32, %c0_i32_0 : i32, i32
  }
  func.func @transform_10(%arg0: i32) -> (i32, i32) {
    %c0_i32 = arith.constant 0 : i32
    %c0_i32_0 = arith.constant 0 : i32
    %c0_i32_1 = arith.constant 0 : i32
    return %c0_i32, %c0_i32_0 : i32, i32
  }
  func.func @transform_11(%arg0: i32) -> (i32, i32) {
    %c0_i32 = arith.constant 0 : i32
    %c0_i32_0 = arith.constant 0 : i32
    %c0_i32_1 = arith.constant 0 : i32
    return %c0_i32, %c0_i32_0 : i32, i32
  }
  func.func @transform_12(%arg0: i32) -> (i32, i32) {
    %c0_i32 = arith.constant 0 : i32
    %c0_i32_0 = arith.constant 0 : i32
    %c0_i32_1 = arith.constant 0 : i32
    return %c0_i32, %c0_i32_0 : i32, i32
  }
  func.func @transform_13(%arg0: i32) -> (i32, i32) {
    %c0_i32 = arith.constant 0 : i32
    %c0_i32_0 = arith.constant 0 : i32
    return %arg0, %c0_i32 : i32, i32
  }
  func.func @transform_14(%arg0: i32) -> (i32, i32) {
    %c0_i32 = arith.constant 0 : i32
    %c0_i32_0 = arith.constant 0 : i32
    return %arg0, %c0_i32 : i32, i32
  }
}

</mosaic_0001>

<bundles_post_ra>
// kernel: autoencoder_forward.1
= control target key start
LH: loop header
LB: loop body
LE: loop exit
PB: predicated region body
PF: predicated region fallthrough
CT: control target
= control target key end

     0   :  { %20 = vsyncpa [#allocation3], 0  ;;  %vm657_vm0 = vcmask 130048   ;;  %s5396_s0 = inlined_call_operand.vmem [shape: f32[8,784], index: 0, kind: input, shape index: {}]   ;;  %s5397_s1 = inlined_call_operand.vmem [shape: bf16[784,256], index: 1, kind: input, shape index: {}]   ;;  %s5398_s2 = inlined_call_operand.vmem [shape: f32[1,256], index: 2, kind: input, shape index: {}]   ;;  %s5399_s3 = inlined_call_operand.vmem [shape: bf16[256,128], index: 3, kind: input, shape index: {}]   ;;  %s5400_s4 = inlined_call_operand.vmem [shape: f32[1,128], index: 4, kind: input, shape index: {}]   ;;  %s5401_s5 = inlined_call_operand.vmem [shape: bf16[128,128], index: 5, kind: input, shape index: {}]   ;;  %s5402_s6 = inlined_call_operand.vmem [shape: f32[1,128], index: 6, kind: input, shape index: {}]   ;;  %s5403_s7 = inlined_call_operand.vmem [shape: bf16[128,128], index: 7, kind: input, shape index: {}]   ;;  %s5404_s8 = inlined_call_operand.vmem [shape: f32[1,128], index: 8, kind: input, shape index: {}]   ;;  %s5405_s9 = inlined_call_operand.vmem [shape: bf16[128,256], index: 9, kind: input, shape index: {}]   ;;  %s5406_s10 = inlined_call_operand.vmem [shape: f32[1,256], index: 10, kind: input, shape index: {}]   ;;  %s5407_s11 = inlined_call_operand.vmem [shape: bf16[256,784], index: 11, kind: input, shape index: {}]   ;;  %s5408_s12 = inlined_call_operand.vmem [shape: f32[1,784], index: 12, kind: input, shape index: {}]   ;;  %s5409_s13 = inlined_call_operand.hbm [shape: f32[8,784], index: 13, kind: output, shape index: {0}]   ;;  %s5410_s14 = inlined_call_operand.hbm [shape: f32[8,128], index: 14, kind: output, shape index: {1}]  }
   0x1   :  { %v2437_v0 = vld [vmem:[%s5397_s1 + $0x70] sm:$0xf]  ;;  %v3435_v1 = vld [vmem:[%s5397_s1 + $0x74] sm:$0xf0]  ;;  %v2429_v11 = vld [vmem:[%s5397_s1 + $0x60] sm:$0xf] }
   0x2   :  { %v2565_v2 = vld [vmem:[%s5397_s1 + $0x170] sm:$0xf]  ;;  %v2438_v3 = vor.u32 %v3435_v1, %v2437_v0  ;;  %v3467_v4 = vld [vmem:[%s5397_s1 + $0x174] sm:$0xf0]  ;;  %v3433_v13 = vld [vmem:[%s5397_s1 + $0x64] sm:$0xf0] }
   0x3   :  { %v2629_v5 = vld [vmem:[%s5397_s1 + $0x1f0] sm:$0xf]  ;;  %v3483_v6 = vld [vmem:[%s5397_s1 + $0x1f4] sm:$0xf0]  ;;  %v2566_v7 = vor.u32 %v3467_v4, %v2565_v2  ;;  %v2557_v14 = vld [vmem:[%s5397_s1 + $0x160] sm:$0xf]  ;;  %v2430_v16 = vor.u32 %v3433_v13, %v2429_v11 }
   0x4   :  { %v2630_v8 = vor.u32 %v3483_v6, %v2629_v5  ;;  %v2501_v9 = vld [vmem:[%s5397_s1 + $0xf0] sm:$0xf]  ;;  %v3451_v10 = vld [vmem:[%s5397_s1 + $0xf4] sm:$0xf0]  ;;  %661 = vmatpush.bf16.msra.mxu0 %v2438_v3  ;;  %v3465_v15 = vld [vmem:[%s5397_s1 + $0x164] sm:$0xf0] }
   0x5   :  { %v2502_v12 = vor.u32 %v3451_v10, %v2501_v9  ;;  %687 = vmatpush.bf16.msra.mxu2 %v2566_v7  ;;  %v2558_v17 = vor.u32 %v3465_v15, %v2557_v14  ;;  %v2621_v18 = vld [vmem:[%s5397_s1 + $0x1e0] sm:$0xf]  ;;  %v3481_v19 = vld [vmem:[%s5397_s1 + $0x1e4] sm:$0xf0]  ;;  %v2421_v23 = vld [vmem:[%s5397_s1 + $0x50] sm:$0xf] }
   0x6   :  { %700 = vmatpush.bf16.msra.mxu3 %v2630_v8  ;;  %v2493_v20 = vld [vmem:[%s5397_s1 + $0xe0] sm:$0xf]  ;;  %v2622_v21 = vor.u32 %v3481_v19, %v2621_v18  ;;  %v3449_v22 = vld [vmem:[%s5397_s1 + $0xe4] sm:$0xf0]  ;;  %v3431_v24 = vld [vmem:[%s5397_s1 + $0x54] sm:$0xf0] }
   0x7   :  { %674 = vmatpush.bf16.msra.mxu1 %v2502_v12  ;;  %v2494_v25 = vor.u32 %v3449_v22, %v2493_v20  ;;  %v2549_v26 = vld [vmem:[%s5397_s1 + $0x150] sm:$0xf]  ;;  %v3463_v27 = vld [vmem:[%s5397_s1 + $0x154] sm:$0xf0]  ;;  %v2422_v29 = vor.u32 %v3431_v24, %v2421_v23  ;;  %v2413_v35 = vld [vmem:[%s5397_s1 + $0x40] sm:$0xf] }
   0x8   :  { %v2613_v28 = vld [vmem:[%s5397_s1 + $0x1d0] sm:$0xf]  ;;  %662 = vmatpush.bf16.msra.mxu0 %v2430_v16  ;;  %v3479_v30 = vld [vmem:[%s5397_s1 + $0x1d4] sm:$0xf0]  ;;  %v2550_v33 = vor.u32 %v3463_v27, %v2549_v26  ;;  %v3429_v36 = vld [vmem:[%s5397_s1 + $0x44] sm:$0xf0] }
   0x9   :  { %v2485_v31 = vld [vmem:[%s5397_s1 + $0xd0] sm:$0xf]  ;;  %v3447_v32 = vld [vmem:[%s5397_s1 + $0xd4] sm:$0xf0]  ;;  %688 = vmatpush.bf16.msra.mxu2 %v2558_v17  ;;  %v2614_v34 = vor.u32 %v3479_v30, %v2613_v28  ;;  %v2541_v37 = vld [vmem:[%s5397_s1 + $0x140] sm:$0xf]  ;;  %v2414_v44 = vor.u32 %v3429_v36, %v2413_v35 }
   0xa   :  { %701 = vmatpush.bf16.msra.mxu3 %v2622_v21  ;;  %v2486_v38 = vor.u32 %v3447_v32, %v2485_v31  ;;  %v3461_v39 = vld [vmem:[%s5397_s1 + $0x144] sm:$0xf0]  ;;  %v2605_v40 = vld [vmem:[%s5397_s1 + $0x1c0] sm:$0xf]  ;;  %v2405_v47 = vld [vmem:[%s5397_s1 + $0x30] sm:$0xf] }
   0xb   :  { %675 = vmatpush.bf16.msra.mxu1 %v2494_v25  ;;  %v3477_v41 = vld [vmem:[%s5397_s1 + $0x1c4] sm:$0xf0]  ;;  %v2477_v42 = vld [vmem:[%s5397_s1 + $0xc0] sm:$0xf]  ;;  %v2542_v45 = vor.u32 %v3461_v39, %v2541_v37  ;;  %v3427_v48 = vld [vmem:[%s5397_s1 + $0x34] sm:$0xf0] }
   0xc   :  { %v3445_v43 = vld [vmem:[%s5397_s1 + $0xc4] sm:$0xf0]  ;;  %663 = vmatpush.bf16.msra.mxu0 %v2422_v29  ;;  %v2606_v46 = vor.u32 %v3477_v41, %v2605_v40  ;;  %v2533_v49 = vld [vmem:[%s5397_s1 + $0x130] sm:$0xf]  ;;  %v3459_v51 = vld [vmem:[%s5397_s1 + $0x134] sm:$0xf0]  ;;  %v2406_v56 = vor.u32 %v3427_v48, %v2405_v47 }
   0xd   :  { %689 = vmatpush.bf16.msra.mxu2 %v2550_v33  ;;  %v2478_v50 = vor.u32 %v3445_v43, %v2477_v42  ;;  %v2597_v52 = vld [vmem:[%s5397_s1 + $0x1b0] sm:$0xf]  ;;  %v3475_v53 = vld [vmem:[%s5397_s1 + $0x1b4] sm:$0xf0]  ;;  %v2534_v57 = vor.u32 %v3459_v51, %v2533_v49  ;;  %v2397_v59 = vld [vmem:[%s5397_s1 + $0x20] sm:$0xf] }
   0xe   :  { %702 = vmatpush.bf16.msra.mxu3 %v2614_v34  ;;  %v2469_v54 = vld [vmem:[%s5397_s1 + $0xb0] sm:$0xf]  ;;  %v3443_v55 = vld [vmem:[%s5397_s1 + $0xb4] sm:$0xf0]  ;;  %v2598_v58 = vor.u32 %v3475_v53, %v2597_v52  ;;  %v3425_v60 = vld [vmem:[%s5397_s1 + $0x24] sm:$0xf0] }
   0xf   :  { %676 = vmatpush.bf16.msra.mxu1 %v2486_v38  ;;  %v2525_v61 = vld [vmem:[%s5397_s1 + $0x120] sm:$0xf]  ;;  %v2470_v62 = vor.u32 %v3443_v55, %v2469_v54  ;;  %v3457_v63 = vld [vmem:[%s5397_s1 + $0x124] sm:$0xf0]  ;;  %v2398_v4 = vor.u32 %v3425_v60, %v2397_v59  ;;  %v2389_v7 = vld [vmem:[%s5397_s1 + $0x10] sm:$0xf] }
  0x10   :  { %664 = vmatpush.bf16.msra.mxu0 %v2414_v44  ;;  %v2589_v0 = vld [vmem:[%s5397_s1 + $0x1a0] sm:$0xf]  ;;  %v3473_v1 = vld [vmem:[%s5397_s1 + $0x1a4] sm:$0xf0]  ;;  %v2526_v5 = vor.u32 %v3457_v63, %v2525_v61  ;;  %v3423_v8 = vld [vmem:[%s5397_s1 + $0x14] sm:$0xf0] }
  0x11   :  { %690 = vmatpush.bf16.msra.mxu2 %v2542_v45  ;;  %v2461_v2 = vld [vmem:[%s5397_s1 + $0xa0] sm:$0xf]  ;;  %v3441_v3 = vld [vmem:[%s5397_s1 + $0xa4] sm:$0xf0]  ;;  %v2590_v6 = vor.u32 %v3473_v1, %v2589_v0  ;;  %v2517_v9 = vld [vmem:[%s5397_s1 + $0x110] sm:$0xf]  ;;  %v2390_v16 = vor.u32 %v3423_v8, %v2389_v7 }
  0x12   :  { %703 = vmatpush.bf16.msra.mxu3 %v2606_v46  ;;  %v2462_v10 = vor.u32 %v3441_v3, %v2461_v2  ;;  %v3455_v11 = vld [vmem:[%s5397_s1 + $0x114] sm:$0xf0]  ;;  %v2581_v12 = vld [vmem:[%s5397_s1 + $0x190] sm:$0xf]  ;;  %v2381_v17 = vld [vmem:[%s5397_s1] sm:$0xf] }
  0x13   :  { %677 = vmatpush.bf16.msra.mxu1 %v2478_v50  ;;  %v3471_v13 = vld [vmem:[%s5397_s1 + $0x194] sm:$0xf0]  ;;  %v2453_v14 = vld [vmem:[%s5397_s1 + $0x90] sm:$0xf]  ;;  %v3421_v18 = vld [vmem:[%s5397_s1 + $0x4] sm:$0xf0]  ;;  %v2518_v20 = vor.u32 %v3455_v11, %v2517_v9 }
  0x14   :  { %665 = vmatpush.bf16.msra.mxu0 %v2406_v56  ;;  %v3439_v15 = vld [vmem:[%s5397_s1 + $0x94] sm:$0xf0]  ;;  %v2509_v19 = vld [vmem:[%s5397_s1 + $0x100] sm:$0xf]  ;;  %v2582_v21 = vor.u32 %v3471_v13, %v2581_v12  ;;  %v3453_v22 = vld [vmem:[%s5397_s1 + $0x104] sm:$0xf0]  ;;  %v2382_v32 = vor.u32 %v3421_v18, %v2381_v17 }
  0x15   :  { %691 = vmatpush.bf16.msra.mxu2 %v2534_v57  ;;  %v2573_v23 = vld [vmem:[%s5397_s1 + $0x180] sm:$0xf]  ;;  %v3469_v24 = vld [vmem:[%s5397_s1 + $0x184] sm:$0xf0]  ;;  %v2454_v25 = vor.u32 %v3439_v15, %v2453_v14  ;;  %v2693_v26 = vld [vmem:[%s5397_s1 + $0x270] sm:$0xf]  ;;  %v2510_v36 = vor.u32 %v3453_v22, %v2509_v19 }
  0x16   :  { %704 = vmatpush.bf16.msra.mxu3 %v2598_v58  ;;  %v3499_v27 = vld [vmem:[%s5397_s1 + $0x274] sm:$0xf0]  ;;  %v3434_v28 = vld [vmem:[%s5397_s1 + $0x74] sm:$0xf]  ;;  %v2439_v29 = vld [vmem:[%s5397_s1 + $0x78] sm:$0xf0]  ;;  %v2574_v37 = vor.u32 %v3469_v24, %v2573_v23 }
  0x17   :  { %678 = vmatpush.bf16.msra.mxu1 %v2470_v62  ;;  %v2445_v30 = vld [vmem:[%s5397_s1 + $0x80] sm:$0xf]  ;;  %v3437_v31 = vld [vmem:[%s5397_s1 + $0x84] sm:$0xf0]  ;;  %v51_v33 = vld [vmem:[%s5396_s0 + $0x10] sm:$0xff]  ;;  %v2694_v41 = vor.u32 %v3499_v27, %v2693_v26  ;;  %v2442_v42 = vor.u32 %v3434_v28, %v2439_v29 }
  0x18   :  { %666 = vmatpush.bf16.msra.mxu0 %v2398_v4  ;;  %v2765_v34 = vld [vmem:[%s5397_s1 + $0x300] sm:$0xf]  ;;  %v3517_v35 = vld [vmem:[%s5397_s1 + $0x304] sm:$0xf0]  ;;  %v2757_v38 = vld [vmem:[%s5397_s1 + $0x2f0] sm:$0xf]  ;;  %v2446_v46 = vor.u32 %v3437_v31, %v2445_v30  ;;  %v4080_v51 = vpack.c.bf16 %v51_v33, %v51_v33 }
  0x19   :  { %692 = vmatpush.bf16.msra.mxu2 %v2526_v5  ;;  %v3515_v39 = vld [vmem:[%s5397_s1 + $0x2f4] sm:$0xf0]  ;;  %v3450_v40 = vld [vmem:[%s5397_s1 + $0xf4] sm:$0xf]  ;;  %v2503_v43 = vld [vmem:[%s5397_s1 + $0xf8] sm:$0xf0]  ;;  %v2766_v47 = vor.u32 %v3517_v35, %v2765_v34 }
  0x1a   :  { %705 = vmatpush.bf16.msra.mxu3 %v2590_v6  ;;  %v2685_v44 = vld [vmem:[%s5397_s1 + $0x260] sm:$0xf]  ;;  %v3497_v48 = vld [vmem:[%s5397_s1 + $0x264] sm:$0xf0]  ;;  %v3432_v49 = vld [vmem:[%s5397_s1 + $0x64] sm:$0xf]  ;;  %v2758_v52 = vor.u32 %v3515_v39, %v2757_v38  ;;  %v2506_v55 = vor.u32 %v3450_v40, %v2503_v43 }
  0x1b   :  { %679 = vmatpush.bf16.msra.mxu1 %v2462_v10  ;;  %v49_v45 = vld [vmem:[%s5396_s0] sm:$0xff]  ;;  %v2431_v50 = vld [vmem:[%s5397_s1 + $0x68] sm:$0xf0]  ;;  %v52_v53 = vld [vmem:[%s5396_s0 + $0x18] sm:$0xff]  ;;  %v2686_v59 = vor.u32 %v3497_v48, %v2685_v44 }
  0x1c   :  { %667 = vmatpush.bf16.msra.mxu0 %v2390_v16  ;;  %v50_v54 = vld [vmem:[%s5396_s0 + $0x8] sm:$0xff]  ;;  %v2749_v56 = vld [vmem:[%s5397_s1 + $0x2e0] sm:$0xf]  ;;  %v4094_v58 = vpack.c.bf16 %v49_v45, %v49_v45  ;;  %v2434_v60 = vor.u32 %v3432_v49, %v2431_v50  ;;  %v3448_v61 = vld [vmem:[%s5397_s1 + $0xe4] sm:$0xf]  ;;  %v4114_v3 = vpack.c.bf16 %v52_v53, %v52_v53 }
  0x1d   :  { %693 = vmatpush.bf16.msra.mxu2 %v2518_v20  ;;  %v3513_v57 = vld [vmem:[%s5397_s1 + $0x2e4] sm:$0xf0]  ;;  %v2495_v62 = vld [vmem:[%s5397_s1 + $0xe8] sm:$0xf0]  ;;  %v2677_v63 = vld [vmem:[%s5397_s1 + $0x250] sm:$0xf]  ;;  %v4116_v4 = vpack.c.bf16 %v50_v54, %v50_v54 }
  0x1e   :  { %706 = vmatpush.bf16.msra.mxu3 %v2582_v21  ;;  %v3495_v0 = vld [vmem:[%s5397_s1 + $0x254] sm:$0xf0]  ;;  %v3430_v1 = vld [vmem:[%s5397_s1 + $0x54] sm:$0xf]  ;;  %v2423_v2 = vld [vmem:[%s5397_s1 + $0x58] sm:$0xf0]  ;;  %v2750_v5 = vor.u32 %v3513_v57, %v2749_v56  ;;  %v2498_v6 = vor.u32 %v3448_v61, %v2495_v62 }
  0x1f   :  { %680 = vmatpush.bf16.msra.mxu1 %v2454_v25  ;;  %v2741_v7 = vld [vmem:[%s5397_s1 + $0x2d0] sm:$0xf]  ;;  %v3511_v8 = vld [vmem:[%s5397_s1 + $0x2d4] sm:$0xf0]  ;;  %v2678_v9 = vor.u32 %v3495_v0, %v2677_v63  ;;  %v2426_v10 = vor.u32 %v3430_v1, %v2423_v2  ;;  %v3446_v11 = vld [vmem:[%s5397_s1 + $0xd4] sm:$0xf] }
  0x20   :  { %668 = vmatpush.bf16.msra.mxu0 %v2382_v32  ;;  %v2487_v12 = vld [vmem:[%s5397_s1 + $0xd8] sm:$0xf0]  ;;  %v2669_v13 = vld [vmem:[%s5397_s1 + $0x240] sm:$0xf]  ;;  %v3493_v14 = vld [vmem:[%s5397_s1 + $0x244] sm:$0xf0]  ;;  %v2742_v17 = vor.u32 %v3511_v8, %v2741_v7 }
  0x21   :  { %694 = vmatpush.bf16.msra.mxu2 %v2510_v36  ;;  %v3428_v15 = vld [vmem:[%s5397_s1 + $0x44] sm:$0xf]  ;;  %v2415_v16 = vld [vmem:[%s5397_s1 + $0x48] sm:$0xf0]  ;;  %v2490_v18 = vor.u32 %v3446_v11, %v2487_v12  ;;  %v2733_v19 = vld [vmem:[%s5397_s1 + $0x2c0] sm:$0xf]  ;;  %v2670_v21 = vor.u32 %v3493_v14, %v2669_v13 }
  0x22   :  { %707 = vmatpush.bf16.msra.mxu3 %v2574_v37  ;;  %v3509_v20 = vld [vmem:[%s5397_s1 + $0x2c4] sm:$0xf0]  ;;  %v2418_v22 = vor.u32 %v3428_v15, %v2415_v16  ;;  %v3444_v23 = vld [vmem:[%s5397_s1 + $0xc4] sm:$0xf]  ;;  %v2479_v24 = vld [vmem:[%s5397_s1 + $0xc8] sm:$0xf0] }
  0x23   :  { %681 = vmatpush.bf16.msra.mxu1 %v2446_v46  ;;  %669 = vmatmul.bf16.vlgmr.msra.gmra.mxu0 %v4094_v58  ;;  %v2661_v25 = vld [vmem:[%s5397_s1 + $0x230] sm:$0xf]  ;;  %v3491_v26 = vld [vmem:[%s5397_s1 + $0x234] sm:$0xf0]  ;;  %v3426_v27 = vld [vmem:[%s5397_s1 + $0x34] sm:$0xf]  ;;  %v2734_v29 = vor.u32 %v3509_v20, %v2733_v19  ;;  %v2482_v30 = vor.u32 %v3444_v23, %v2479_v24 }
  0x24   :  { %713 = vmatpush.bf16.msrb.mxu0 %v2694_v41  ;;  %695 = vmatmul.bf16.vlgmr.msra.gmra.mxu2 %v4080_v51  ;;  %v2407_v28 = vld [vmem:[%s5397_s1 + $0x38] sm:$0xf0]  ;;  %v2725_v31 = vld [vmem:[%s5397_s1 + $0x2b0] sm:$0xf]  ;;  %v3507_v32 = vld [vmem:[%s5397_s1 + $0x2b4] sm:$0xf0]  ;;  %v2662_v34 = vor.u32 %v3491_v26, %v2661_v25 }
  0x25   :  { %746 = vmatpush.bf16.msrb.mxu2 %v2766_v47  ;;  %708 = vmatmul.bf16.vlgmr.msra.gmra.mxu3 %v4114_v3  ;;  %v55_v33 = vld [vmem:[%s5396_s0 + $0x30] sm:$0xff]  ;;  %v2410_v35 = vor.u32 %v3426_v27, %v2407_v28  ;;  %v2471_v37 = vld [vmem:[%s5397_s1 + $0xb8] sm:$0xf0]  ;;  %v2653_v38 = vld [vmem:[%s5397_s1 + $0x220] sm:$0xf] }
  0x26   :  { %752 = vmatpush.bf16.msrb.mxu3 %v2442_v42  ;;  %682 = vmatmul.bf16.vlgmr.msra.gmra.mxu1 %v4116_v4  ;;  %v3442_v36 = vld [vmem:[%s5397_s1 + $0xb4] sm:$0xf]  ;;  %v3489_v39 = vld [vmem:[%s5397_s1 + $0x224] sm:$0xf0]  ;;  %v3424_v40 = vld [vmem:[%s5397_s1 + $0x24] sm:$0xf]  ;;  %v2726_v42 = vor.u32 %v3507_v32, %v2725_v31  ;;  %v4197_v43 = vpack.c.bf16 %v55_v33, %v55_v33 }
  0x27   :  { %726 = vmatpush.bf16.msrb.mxu1 %v2758_v52  ;;  %v2399_v41 = vld [vmem:[%s5397_s1 + $0x28] sm:$0xf0]  ;;  %v2474_v44 = vor.u32 %v3442_v36, %v2471_v37  ;;  %v2717_v45 = vld [vmem:[%s5397_s1 + $0x2a0] sm:$0xf]  ;;  %v3505_v46 = vld [vmem:[%s5397_s1 + $0x2a4] sm:$0xf0]  ;;  %v2654_v47 = vor.u32 %v3489_v39, %v2653_v38 }
  0x28   :  { %714 = vmatpush.bf16.msrb.mxu0 %v2686_v59  ;;  %v2402_v48 = vor.u32 %v3424_v40, %v2399_v41  ;;  %v3440_v49 = vld [vmem:[%s5397_s1 + $0xa4] sm:$0xf]  ;;  %v2463_v50 = vld [vmem:[%s5397_s1 + $0xa8] sm:$0xf0]  ;;  %v2645_v52 = vld [vmem:[%s5397_s1 + $0x210] sm:$0xf]  ;;  %v2718_v56 = vor.u32 %v3505_v46, %v2717_v45 }
  0x29   :  { %765 = vmatpush.bf16.msra.mxu2 %v2506_v55  ;;  %v3487_v53 = vld [vmem:[%s5397_s1 + $0x214] sm:$0xf0]  ;;  %v3422_v54 = vld [vmem:[%s5397_s1 + $0x14] sm:$0xf]  ;;  %v2391_v55 = vld [vmem:[%s5397_s1 + $0x18] sm:$0xf0]  ;;  %v2466_v57 = vor.u32 %v3440_v49, %v2463_v50 }
  0x2a   :  { %753 = vmatpush.bf16.msrb.mxu3 %v2434_v60  ;;  %v2709_v59 = vld [vmem:[%s5397_s1 + $0x290] sm:$0xf]  ;;  %v3503_v60 = vld [vmem:[%s5397_s1 + $0x294] sm:$0xf0]  ;;  %v3438_v61 = vld [vmem:[%s5397_s1 + $0x94] sm:$0xf]  ;;  %v2646_v62 = vor.u32 %v3487_v53, %v2645_v52  ;;  %v2394_v63 = vor.u32 %v3422_v54, %v2391_v55 }
  0x2b   :  { %727 = vmatpush.bf16.msrb.mxu1 %v2750_v5  ;;  %v2455_v0 = vld [vmem:[%s5397_s1 + $0x98] sm:$0xf0]  ;;  %v2637_v1 = vld [vmem:[%s5397_s1 + $0x200] sm:$0xf]  ;;  %v3485_v2 = vld [vmem:[%s5397_s1 + $0x204] sm:$0xf0]  ;;  %v2710_v8 = vor.u32 %v3503_v60, %v2709_v59 }
  0x2c   :  { %715 = vmatpush.bf16.msrb.mxu0 %v2678_v9  ;;  %v3420_v5 = vld [vmem:[%s5397_s1 + $0x4] sm:$0xf]  ;;  %v3466_v7 = vld [vmem:[%s5397_s1 + $0x174] sm:$0xf]  ;;  %v2567_v9 = vld [vmem:[%s5397_s1 + $0x178] sm:$0xf0]  ;;  %v2458_v12 = vor.u32 %v3438_v61, %v2455_v0  ;;  %v2638_v16 = vor.u32 %v3485_v2, %v2637_v1 }
  0x2d   :  { %766 = vmatpush.bf16.msra.mxu2 %v2498_v6  ;;  %v2383_v6 = vld [vmem:[%s5397_s1 + $0x8] sm:$0xf0]  ;;  %v2695_v11 = vld [vmem:[%s5397_s1 + $0x278] sm:$0xf0]  ;;  %v2701_v13 = vld [vmem:[%s5397_s1 + $0x280] sm:$0xf] }
  0x2e   :  { %754 = vmatpush.bf16.msrb.mxu3 %v2426_v10  ;;  %v3498_v10 = vld [vmem:[%s5397_s1 + $0x274] sm:$0xf]  ;;  %v3501_v14 = vld [vmem:[%s5397_s1 + $0x284] sm:$0xf0]  ;;  %v53_v15 = vld [vmem:[%s5396_s0 + $0x20] sm:$0xff] }
  0x2f   :  { %728 = vmatpush.bf16.msrb.mxu1 %v2742_v17  ;;  %v2386_v17 = vor.u32 %v3420_v5, %v2383_v6  ;;  %v2447_v19 = vld [vmem:[%s5397_s1 + $0x88] sm:$0xf0]  ;;  %v3482_v20 = vld [vmem:[%s5397_s1 + $0x1f4] sm:$0xf]  ;;  %v2631_v23 = vld [vmem:[%s5397_s1 + $0x1f8] sm:$0xf0]  ;;  %v2702_v26 = vor.u32 %v3501_v14, %v2701_v13 }
  0x30   :  { %716 = vmatpush.bf16.msrb.mxu0 %v2670_v21  ;;  %v2570_v21 = vor.u32 %v3466_v7, %v2567_v9  ;;  %v3514_v24 = vld [vmem:[%s5397_s1 + $0x2f4] sm:$0xf]  ;;  %v2759_v25 = vld [vmem:[%s5397_s1 + $0x2f8] sm:$0xf0]  ;;  %v54_v27 = vld [vmem:[%s5396_s0 + $0x28] sm:$0xff] }
  0x31   :  { %767 = vmatpush.bf16.msra.mxu2 %v2490_v18  ;;  %v3436_v18 = vld [vmem:[%s5397_s1 + $0x84] sm:$0xf]  ;;  %v2687_v33 = vld [vmem:[%s5397_s1 + $0x268] sm:$0xf0]  ;;  %v4308_v37 = vpack.c.bf16 %v54_v27, %v54_v27  ;;  %v2551_v45 = vld [vmem:[%s5397_s1 + $0x158] sm:$0xf0] }
  0x32   :  { %755 = vmatpush.bf16.msrb.mxu3 %v2418_v22  ;;  %v2698_v22 = vor.u32 %v3498_v10, %v2695_v11  ;;  %v3464_v28 = vld [vmem:[%s5397_s1 + $0x164] sm:$0xf]  ;;  %v2450_v31 = vor.u32 %v3436_v18, %v2447_v19  ;;  %v2623_v39 = vld [vmem:[%s5397_s1 + $0x1e8] sm:$0xf0]  ;;  %v3494_v46 = vld [vmem:[%s5397_s1 + $0x254] sm:$0xf] }
  0x33   :  { %729 = vmatpush.bf16.msrb.mxu1 %v2734_v29  ;;  %v2559_v29 = vld [vmem:[%s5397_s1 + $0x168] sm:$0xf0]  ;;  %v3496_v32 = vld [vmem:[%s5397_s1 + $0x264] sm:$0xf]  ;;  %v3478_v50 = vld [vmem:[%s5397_s1 + $0x1d4] sm:$0xf] }
  0x34   :  { %717 = vmatpush.bf16.msrb.mxu0 %v2662_v34  ;;  %2771 = vmatmul.msk.bf16.vlgmr.msrb.gmra.mxu2 %vm657_vm0, %v4197_v43  ;;  %v2634_v34 = vor.u32 %v3482_v20, %v2631_v23  ;;  %v3480_v36 = vld [vmem:[%s5397_s1 + $0x1e4] sm:$0xf]  ;;  %v2562_v38 = vor.u32 %v3464_v28, %v2559_v29  ;;  %v2751_v41 = vld [vmem:[%s5397_s1 + $0x2e8] sm:$0xf0]  ;;  %v2615_v52 = vld [vmem:[%s5397_s1 + $0x1d8] sm:$0xf0] }
  0x35   :  { %768 = vmatpush.bf16.msra.mxu2 %v2482_v30  ;;  %v4297_v30 = vpack.c.bf16 %v53_v15, %v53_v15  ;;  %v3512_v40 = vld [vmem:[%s5397_s1 + $0x2e4] sm:$0xf]  ;;  %v3510_v53 = vld [vmem:[%s5397_s1 + $0x2d4] sm:$0xf]  ;;  %v2743_v55 = vld [vmem:[%s5397_s1 + $0x2d8] sm:$0xf0] }
  0x36   :  { %756 = vmatpush.bf16.msrb.mxu3 %v2410_v35  ;;  %v2762_v35 = vor.u32 %v3514_v24, %v2759_v25  ;;  %v2754_v49 = vor.u32 %v3512_v40, %v2751_v41  ;;  %v3492_v60 = vld [vmem:[%s5397_s1 + $0x244] sm:$0xf]  ;;  %v2671_v61 = vld [vmem:[%s5397_s1 + $0x248] sm:$0xf0] }
  0x37   :  { %730 = vmatpush.bf16.msrb.mxu1 %v2726_v42  ;;  %v2690_v42 = vor.u32 %v3496_v32, %v2687_v33 }
  0x38   :  { %718 = vmatpush.bf16.msrb.mxu0 %v2654_v47  ;;  %v2679_v47 = vld [vmem:[%s5397_s1 + $0x258] sm:$0xf0] }
  0x39   :  { %769 = vmatpush.bf16.msra.mxu2 %v2474_v44  ;;  %v3462_v44 = vld [vmem:[%s5397_s1 + $0x154] sm:$0xf]  ;;  %v2682_v59 = vor.u32 %v3494_v46, %v2679_v47 }
  0x3a   :  { %757 = vmatpush.bf16.msrb.mxu3 %v2402_v48  ;;  %v2626_v48 = vor.u32 %v3480_v36, %v2623_v39  ;;  %v2554_v54 = vor.u32 %v3462_v44, %v2551_v45 }
  0x3b   :  { %731 = vmatpush.bf16.msrb.mxu1 %v2718_v56  ;;  %v3460_v56 = vld [vmem:[%s5397_s1 + $0x144] sm:$0xf] }
  0x3c   :  { %719 = vmatpush.bf16.msrb.mxu0 %v2646_v62 }
  0x3d   :  { %770 = vmatpush.bf16.msra.mxu2 %v2466_v57  ;;  %v2543_v57 = vld [vmem:[%s5397_s1 + $0x148] sm:$0xf0] }
  0x3e   :  { %758 = vmatpush.bf16.msrb.mxu3 %v2394_v63 }
  0x3f   :  { %732 = vmatpush.bf16.msrb.mxu1 %v2710_v8 }
  0x40   :  { %720 = vmatpush.bf16.msrb.mxu0 %v2638_v16 }
  0x41   :  { %771 = vmatpush.bf16.msra.mxu2 %v2458_v12 }
  0x42   :  { %759 = vmatpush.bf16.msrb.mxu3 %v2386_v17 }
  0x43   :  { %733 = vmatpush.bf16.msrb.mxu1 %v2702_v26  ;;  %721 = vmatmul.bf16.vlgmr.msrb.gmra.mxu0 %v4297_v30 }
  0x44   :  { %778 = vmatpush.bf16.msra.mxu0 %v2570_v21 }
  0x45   :  { %772 = vmatpush.bf16.msra.mxu2 %v2450_v31  ;;  %760 = vmatmul.bf16.vlgmr.msrb.gmra.mxu3 %v4094_v58 }
  0x46   :  { %804 = vmatpush.bf16.msra.mxu3 %v2698_v22  ;;  %734 = vmatmul.bf16.vlgmr.msrb.gmra.mxu1 %v4308_v37 }
  0x47   :  { %791 = vmatpush.bf16.msra.mxu1 %v2634_v34 }
  0x48   :  { %779 = vmatpush.bf16.msra.mxu0 %v2562_v38  ;;  %773 = vmatmul.bf16.vlgmr.msra.gmra.mxu2 %v4116_v4 }
  0x49   :  { %817 = vmatpush.bf16.msrb.mxu2 %v2762_v35 }
  0x4a   :  { %805 = vmatpush.bf16.msra.mxu3 %v2690_v42 }
  0x4b   :  { %21 = vsyncpa [#allocation5], 0  ;;  %792 = vmatpush.bf16.msra.mxu1 %v2626_v48  ;;  %v2618_v62 = vor.u32 %v3478_v50, %v2615_v52  ;;  %v2746_v63 = vor.u32 %v3510_v53, %v2743_v55  ;;  %v3476_v0 = vld [vmem:[%s5397_s1 + $0x1c4] sm:$0xf]  ;;  %v2546_v1 = vor.u32 %v3460_v56, %v2543_v57  ;;  %v2607_v2 = vld [vmem:[%s5397_s1 + $0x1c8] sm:$0xf0]  ;;  %v2674_v5 = vor.u32 %v3492_v60, %v2671_v61 }
  0x4c   :  { %780 = vmatpush.bf16.msra.mxu0 %v2554_v54  ;;  %v3508_v4 = vld [vmem:[%s5397_s1 + $0x2c4] sm:$0xf]  ;;  %v2735_v58 = vld [vmem:[%s5397_s1 + $0x2c8] sm:$0xf0]  ;;  %v3458_v6 = vld [vmem:[%s5397_s1 + $0x134] sm:$0xf]  ;;  %v2610_v10 = vor.u32 %v3476_v0, %v2607_v2 }
  0x4d   :  { %818 = vmatpush.bf16.msrb.mxu2 %v2754_v49  ;;  %v2535_v7 = vld [vmem:[%s5397_s1 + $0x138] sm:$0xf0]  ;;  %v3490_v8 = vld [vmem:[%s5397_s1 + $0x234] sm:$0xf]  ;;  %v2738_v11 = vor.u32 %v3508_v4, %v2735_v58  ;;  %v3456_v18 = vld [vmem:[%s5397_s1 + $0x124] sm:$0xf] }
  0x4e   :  { %806 = vmatpush.bf16.msra.mxu3 %v2682_v59  ;;  %v2663_v9 = vld [vmem:[%s5397_s1 + $0x238] sm:$0xf0]  ;;  %v3474_v12 = vld [vmem:[%s5397_s1 + $0x1b4] sm:$0xf]  ;;  %v2538_v13 = vor.u32 %v3458_v6, %v2535_v7  ;;  %v2527_v19 = vld [vmem:[%s5397_s1 + $0x128] sm:$0xf0] }
  0x4f   :  { %793 = vmatpush.bf16.msra.mxu1 %v2618_v62  ;;  %v2599_v14 = vld [vmem:[%s5397_s1 + $0x1b8] sm:$0xf0]  ;;  %v3506_v15 = vld [vmem:[%s5397_s1 + $0x2b4] sm:$0xf]  ;;  %v2666_v17 = vor.u32 %v3490_v8, %v2663_v9  ;;  %v3488_v20 = vld [vmem:[%s5397_s1 + $0x224] sm:$0xf]  ;;  %v2530_v25 = vor.u32 %v3456_v18, %v2527_v19 }
  0x50   :  { %781 = vmatpush.bf16.msra.mxu0 %v2546_v1  ;;  %v2727_v16 = vld [vmem:[%s5397_s1 + $0x2b8] sm:$0xf0]  ;;  %v2655_v21 = vld [vmem:[%s5397_s1 + $0x228] sm:$0xf0]  ;;  %v2602_v22 = vor.u32 %v3474_v12, %v2599_v14  ;;  %v3472_v24 = vld [vmem:[%s5397_s1 + $0x1a4] sm:$0xf] }
  0x51   :  { %819 = vmatpush.bf16.msrb.mxu2 %v2746_v63  ;;  %v2730_v23 = vor.u32 %v3506_v15, %v2727_v16  ;;  %v2591_v26 = vld [vmem:[%s5397_s1 + $0x1a8] sm:$0xf0]  ;;  %v3504_v27 = vld [vmem:[%s5397_s1 + $0x2a4] sm:$0xf]  ;;  %v2658_v29 = vor.u32 %v3488_v20, %v2655_v21  ;;  %v3454_v31 = vld [vmem:[%s5397_s1 + $0x114] sm:$0xf] }
  0x52   :  { %807 = vmatpush.bf16.msra.mxu3 %v2674_v5  ;;  %v2719_v28 = vld [vmem:[%s5397_s1 + $0x2a8] sm:$0xf0]  ;;  %v2519_v32 = vld [vmem:[%s5397_s1 + $0x118] sm:$0xf0]  ;;  %v3486_v33 = vld [vmem:[%s5397_s1 + $0x214] sm:$0xf]  ;;  %v2594_v35 = vor.u32 %v3472_v24, %v2591_v26 }
  0x53   :  { %794 = vmatpush.bf16.msra.mxu1 %v2610_v10  ;;  %v2647_v34 = vld [vmem:[%s5397_s1 + $0x218] sm:$0xf0]  ;;  %v2722_v36 = vor.u32 %v3504_v27, %v2719_v28  ;;  %v3470_v38 = vld [vmem:[%s5397_s1 + $0x194] sm:$0xf]  ;;  %v2522_v39 = vor.u32 %v3454_v31, %v2519_v32  ;;  %v3452_v45 = vld [vmem:[%s5397_s1 + $0x104] sm:$0xf] }
  0x54   :  { %782 = vmatpush.bf16.msra.mxu0 %v2538_v13  ;;  %v2583_v40 = vld [vmem:[%s5397_s1 + $0x198] sm:$0xf0]  ;;  %v3502_v41 = vld [vmem:[%s5397_s1 + $0x294] sm:$0xf]  ;;  %v2650_v44 = vor.u32 %v3486_v33, %v2647_v34  ;;  %v2511_v46 = vld [vmem:[%s5397_s1 + $0x108] sm:$0xf0] }
  0x55   :  { %820 = vmatpush.bf16.msrb.mxu2 %v2738_v11  ;;  %v2711_v42 = vld [vmem:[%s5397_s1 + $0x298] sm:$0xf0]  ;;  %v3484_v47 = vld [vmem:[%s5397_s1 + $0x204] sm:$0xf]  ;;  %v2639_v48 = vld [vmem:[%s5397_s1 + $0x208] sm:$0xf0]  ;;  %v2586_v52 = vor.u32 %v3470_v38, %v2583_v40  ;;  %v2514_v54 = vor.u32 %v3452_v45, %v2511_v46 }
  0x56   :  { %808 = vmatpush.bf16.msra.mxu3 %v2666_v17  ;;  %v3516_v49 = vld [vmem:[%s5397_s1 + $0x304] sm:$0xf]  ;;  %v2767_v50 = vld [vmem:[%s5397_s1 + $0x308] sm:$0xf0]  ;;  %v2714_v53 = vor.u32 %v3502_v41, %v2711_v42  ;;  %v2642_v57 = vor.u32 %v3484_v47, %v2639_v48  ;;  %v3525_v0 = vld [vmem:[%s5399_s3 + $0x38] sm:$0xff]  ;;  %s3763_s21 = smov [#allocation4]  }
  0x57   :  { %795 = vmatpush.bf16.msra.mxu1 %v2602_v22  ;;  %v3468_v55 = vld [vmem:[%s5397_s1 + $0x184] sm:$0xf]  ;;  %v2575_v56 = vld [vmem:[%s5397_s1 + $0x188] sm:$0xf0]  ;;  %v2770_v61 = vor.u32 %v3516_v49, %v2767_v50  ;;  %v3524_v1 = vld [vmem:[%s5399_s3 + $0x30] sm:$0xff]  ;;  %s2365_s0 = sshll.u32 %s5410_s14, 4  ;;  %s2366_s0 = int_to_ptr.hbm [resolvable:$true] %s2365_s0 }
  0x58   :  { %783 = vmatpush.bf16.msra.mxu0 %v2530_v25  ;;  %v3500_v59 = vld [vmem:[%s5397_s1 + $0x284] sm:$0xf]  ;;  %v2703_v60 = vld [vmem:[%s5397_s1 + $0x288] sm:$0xf0]  ;;  %v2578_v62 = vor.u32 %v3468_v55, %v2575_v56  ;;  %v161_v6 = vld [vmem:[%s5398_s2] sm:$0x3] }
  0x59   :  { %821 = vmatpush.bf16.msrb.mxu2 %v2730_v23  ;;  %v2706_v63 = vor.u32 %v3500_v59, %v2703_v60  ;;  %v3518_v58 = vld [vmem:[%s5399_s3] sm:$0xff]  ;;  %v3533_v9 = vld [vmem:[%s5399_s3 + $0x78] sm:$0xff]  ;;  %v163_v11 = vperm.slane %v161_v6, 0  ;;  %v3532_v13 = vld [vmem:[%s5399_s3 + $0x70] sm:$0xff]  ;;  %v164_v42 = vperm.slane %v161_v6, 1 }
  0x5a   :  { %809 = vmatpush.bf16.msra.mxu3 %v2658_v29  ;;  %v3531_v19 = vld [vmem:[%s5399_s3 + $0x68] sm:$0xff]  ;;  %v3530_v22 = vld [vmem:[%s5399_s3 + $0x60] sm:$0xff]  ;;  %v3529_v27 = vld [vmem:[%s5399_s3 + $0x58] sm:$0xff] }
  0x5b   :  { %796 = vmatpush.bf16.msra.mxu1 %v2594_v35  ;;  %v3528_v32 = vld [vmem:[%s5399_s3 + $0x50] sm:$0xff]  ;;  %v3527_v38 = vld [vmem:[%s5399_s3 + $0x48] sm:$0xff]  ;;  %v3549_v6 = vld [vmem:[%s5403_s7 + $0x38] sm:$0xff] }
  0x5c   :  { %784 = vmatpush.bf16.msra.mxu0 %v2522_v39  ;;  %v3526_v39 = vld [vmem:[%s5399_s3 + $0x40] sm:$0xff] }
  0x5d   :  { %822 = vmatpush.bf16.msrb.mxu2 %v2722_v36 }
  0x5e   :  { %810 = vmatpush.bf16.msra.mxu3 %v2650_v44 }
  0x5f   :  { %797 = vmatpush.bf16.msra.mxu1 %v2586_v52 }
  0x60   :  { %785 = vmatpush.bf16.msra.mxu0 %v2514_v54 }
  0x61   :  { %823 = vmatpush.bf16.msrb.mxu2 %v2714_v53 }
  0x62   :  { %811 = vmatpush.bf16.msra.mxu3 %v2642_v57 }
  0x63   :  { %798 = vmatpush.bf16.msra.mxu1 %v2578_v62  ;;  %786 = vmatmul.bf16.vlgmr.msra.gmra.mxu0 %v4080_v51  ;;  %v3523_v51 = vld [vmem:[%s5399_s3 + $0x28] sm:$0xff] }
  0x64   :  { %837 = vmatpush.bf16.msrb.mxu0 %v2770_v61 }
  0x65   :  { %812 = vmatmul.bf16.vlgmr.msra.gmra.mxu3 %v4297_v30  ;;  %824 = vmatpush.bf16.msrb.mxu2 %v2706_v63  ;;  %v3520_v30 = vld [vmem:[%s5399_s3 + $0x10] sm:$0xff] }
  0x66   :  { %799 = vmatmul.bf16.vlgmr.msra.gmra.mxu1 %v4114_v3  ;;  %v3522_v3 = vld [vmem:[%s5399_s3 + $0x20] sm:$0xff]  ;;  %992 = vmatpush.bf16.msrb.mxu3 %v3533_v9 }
  0x67   :  { %979 = vmatpush.bf16.msrb.mxu1 %v3525_v0  ;;  %v3546_v9 = vld [vmem:[%s5403_s7 + $0x20] sm:$0xff] }
  0x68   :  { %825 = vmatmul.bf16.vlgmr.msrb.gmra.mxu2 %v4308_v37  ;;  %v3519_v37 = vld [vmem:[%s5399_s3 + $0x8] sm:$0xff] }
  0x69   :  { %1158 = vmatpush.bf16.msra.mxu2 %v3549_v6  ;;  %v3550_v6 = vld [vmem:[%s5405_s9 + $0x4] sm:$0xf] }
  0x6a   :  { %993 = vmatpush.bf16.msrb.mxu3 %v3532_v13  ;;  %v3543_v13 = vld [vmem:[%s5403_s7 + $0x8] sm:$0xff] }
  0x6b   :  { %980 = vmatpush.bf16.msrb.mxu1 %v3524_v1  ;;  %v3541_v1 = vld [vmem:[%s5401_s5 + $0x38] sm:$0xff] }
  0x6c   :  { %1075 = vmatpush.bf16.msra.mxu0 %v3541_v1 }
  0x6e   :  { %994 = vmatpush.bf16.msrb.mxu3 %v3531_v19 }
  0x6f   :  { %981 = vmatpush.bf16.msrb.mxu1 %v3523_v51  ;;  %v3540_v51 = vld [vmem:[%s5401_s5 + $0x30] sm:$0xff] }
  0x70   :  { %1076 = vmatpush.bf16.msra.mxu0 %v3540_v51 }
  0x72   :  { %995 = vmatpush.bf16.msrb.mxu3 %v3530_v22  ;;  %v3565_v22 = vld [vmem:[%s5405_s9 + $0x74] sm:$0xf0] }
  0x73   :  { %2772 = vmatmul.msk.bf16.vlgmr.msrb.gmra.mxu0 %vm657_vm0, %v4197_v43  ;;  %982 = vmatpush.bf16.msrb.mxu1 %v3522_v3  ;;  %v3521_v43 = vld [vmem:[%s5399_s3 + $0x18] sm:$0xff]  ;;  %v3539_v3 = vld [vmem:[%s5401_s5 + $0x28] sm:$0xff]  ;;  %s2354_s3 = sshll.u32 %s5409_s13, 4  ;;  %s2355_s3 = int_to_ptr.hbm [resolvable:$true] %s2354_s3 }
  0x74   :  { %1077 = vmatpush.bf16.msra.mxu0 %v3539_v3  ;;  %v2911_v3 = vld [vmem:[%s5405_s9 + $0x10] sm:$0xf] }
  0x76   :  { %996 = vmatpush.bf16.msrb.mxu3 %v3529_v27  ;;  %v3563_v27 = vld [vmem:[%s5405_s9 + $0x64] sm:$0xf0] }
  0x77   :  { %983 = vmatpush.bf16.msrb.mxu1 %v3521_v43  ;;  %v3538_v43 = vld [vmem:[%s5401_s5 + $0x20] sm:$0xff] }
  0x78   :  { %1078 = vmatpush.bf16.msra.mxu0 %v3538_v43  ;;  %v3553_v43 = vld [vmem:[%s5405_s9 + $0x14] sm:$0xf0] }
  0x7a   :  { %997 = vmatpush.bf16.msrb.mxu3 %v3528_v32 }
  0x7b   :  { %984 = vmatpush.bf16.msrb.mxu1 %v3520_v30  ;;  %v3537_v30 = vld [vmem:[%s5401_s5 + $0x18] sm:$0xff] }
  0x7c   :  { %1079 = vmatpush.bf16.msra.mxu0 %v3537_v30  ;;  %v3552_v30 = vld [vmem:[%s5405_s9 + $0x14] sm:$0xf] }
  0x7e   :  { %998 = vmatpush.bf16.msrb.mxu3 %v3527_v38  ;;  %v2945_v38 = vld [vmem:[%s5405_s9 + $0x58] sm:$0xf0] }
  0x7f   :  { %985 = vmatpush.bf16.msrb.mxu1 %v3519_v37  ;;  %v3536_v37 = vld [vmem:[%s5401_s5 + $0x10] sm:$0xff] }
  0x80   :  { %1080 = vmatpush.bf16.msra.mxu0 %v3536_v37  ;;  %v2912_v37 = vor.u32 %v3553_v43, %v2911_v3  ;;  %v3275_v3 = vld [vmem:[%s5407_s11 + $0x268] sm:$0xf] }
  0x82   :  { %999 = vmatpush.bf16.msrb.mxu3 %v3526_v39 }
  0x83   :  { %986 = vmatpush.bf16.msrb.mxu1 %v3518_v58  ;;  %v3535_v58 = vld [vmem:[%s5401_s5 + $0x8] sm:$0xff] }
  0x84   :  { %1081 = vmatpush.bf16.msra.mxu0 %v3535_v58  ;;  %v2903_v58 = vld [vmem:[%s5405_s9] sm:$0xf] }
  0xa0   :  { %v670_v2 = vpop.f32.mrf.mxu0 }
  0xa1   :  { %v671_v14 = vadd.f32 %v670_v2, %v163_v11  ;;  %v3544_v11 = vld [vmem:[%s5403_s7 + $0x10] sm:$0xff] }
  0xa3   :  { %v683_v4 = vpop.f32.mrf.mxu1 }
  0xa4   :  { %v684_v16 = vadd.f32 %v683_v4, %v671_v14 }
  0xa7   :  { %v696_v5 = vpop.f32.mrf.mxu2 }
  0xa8   :  { %v709_v7 = vpop.f32.mrf.mxu3  ;;  %v672_v8 = vpop.f32.mrf.mxu0  ;;  %v697_v18 = vadd.f32 %v696_v5, %v684_v16  ;;  %v3534_v5 = vld [vmem:[%s5401_s5] sm:$0xff] }
  0xa9   :  { %1082 = vmatpush.bf16.msra.mxu0 %v3534_v5  ;;  %v3547_v8 = vld [vmem:[%s5403_s7 + $0x28] sm:$0xff] }
  0xaa   :  { %v710_v20 = vadd.f32 %v709_v7, %v697_v18  ;;  %v3548_v7 = vld [vmem:[%s5403_s7 + $0x30] sm:$0xff]  ;;  %v3551_v5 = vld [vmem:[%s5405_s9 + $0x4] sm:$0xf0] }
  0xab   :  { %v685_v10 = vpop.f32.mrf.mxu1  ;;  %1159 = vmatpush.bf16.msra.mxu2 %v3548_v7  ;;  %v2904_v7 = vor.u32 %v3551_v5, %v2903_v58  ;;  %v3023_v58 = vld [vmem:[%s5407_s11 + $0x70] sm:$0xf]  ;;  %v3583_v5 = vld [vmem:[%s5407_s11 + $0x88] sm:$0xf0] }
  0xac   :  { %v3545_v10 = vld [vmem:[%s5403_s7 + $0x18] sm:$0xff] }
  0xaf   :  { %v698_v12 = vpop.f32.mrf.mxu2  ;;  %1160 = vmatpush.bf16.msra.mxu2 %v3547_v8  ;;  %v2905_v8 = vld [vmem:[%s5405_s9 + $0x8] sm:$0xf0] }
  0xb0   :  { %v711_v15 = vpop.f32.mrf.mxu3  ;;  %v3680_v12 = vld [vmem:[%s5400_s4] ss:$0 sm:$0xff] }
  0xb3   :  { %1161 = vmatpush.bf16.msra.mxu2 %v3546_v9  ;;  %v2908_v9 = vor.u32 %v3550_v6, %v2905_v8  ;;  %v3580_v6 = vld [vmem:[%s5407_s11 + $0x74] sm:$0xf] }
  0xb7   :  { %v748_v17 = vpop.f32.mrf.mxu2  ;;  %1162 = vmatpush.bf16.msra.mxu2 %v3545_v10  ;;  %v3163_v10 = vld [vmem:[%s5407_s11 + $0x188] sm:$0xf] }
  0xbb   :  { %1163 = vmatpush.bf16.msra.mxu2 %v3544_v11  ;;  %v3618_v11 = vld [vmem:[%s5407_s11 + $0x1a0] sm:$0xf0] }
  0xbf   :  { %v750_v24 = vpop.f32.mrf.mxu2  ;;  %1164 = vmatpush.bf16.msra.mxu2 %v3543_v13  ;;  %v3164_v13 = vor.u32 %v3618_v11, %v3163_v10  ;;  %v3247_v10 = vld [vmem:[%s5407_s11 + $0x230] sm:$0xf]  ;;  %v3024_v11 = vor.u32 %v3583_v5, %v3023_v58 }
  0xc0   :  { %v722_v21 = vpop.f32.mrf.mxu0 }
  0xc1   :  { %v723_v23 = vadd.f32 %v722_v21, %v710_v20  ;;  %v3542_v20 = vld [vmem:[%s5403_s7] sm:$0xff]  ;;  %v2959_v21 = vld [vmem:[%s5405_s9 + $0x70] sm:$0xf]  ;;  %2025 = vmatpush.bf16.msrb.mxu0 %v3164_v13  ;;  %v3636_v13 = vld [vmem:[%s5407_s11 + $0x234] sm:$0xf] }
  0xc2   :  { %v2960_v24 = vor.u32 %v3565_v22, %v2959_v21  ;;  %v3674_v22 = vld [vmem:[%s5407_s11 + $0x360] sm:$0xf0] }
  0xc3   :  { %v735_v25 = vpop.f32.mrf.mxu1  ;;  %1165 = vmatpush.bf16.msra.mxu2 %v3542_v20  ;;  %v3387_v20 = vld [vmem:[%s5407_s11 + $0x348] sm:$0xf] }
  0xc4   :  { %v736_v26 = vadd.f32 %v735_v25, %v723_v23  ;;  %v3564_v23 = vld [vmem:[%s5405_s9 + $0x74] sm:$0xf]  ;;  %v2961_v25 = vld [vmem:[%s5405_s9 + $0x78] sm:$0xf0]  ;;  %1275 = vmatpush.bf16.msra.mxu1 %v2960_v24  ;;  %v3389_v24 = vld [vmem:[%s5407_s11 + $0x364] sm:$0xf0] }
  0xc6   :  { %v749_v28 = vadd.f32 %v748_v17, %v736_v26  ;;  %v2951_v26 = vld [vmem:[%s5405_s9 + $0x60] sm:$0xf] }
  0xc7   :  { %v2952_v32 = vor.u32 %v3563_v27, %v2951_v26  ;;  %v3388_v26 = vor.u32 %v3674_v22, %v3387_v20  ;;  %v2997_v20 = vld [vmem:[%s5407_s11 + $0x54] sm:$0xf0] }
  0xc8   :  { %v843_v29 = vmax.f32 %v749_v28, 0.0  ;;  %v724_v31 = vpop.f32.mrf.mxu0  ;;  %v761_v35 = vpop.f32.mrf.mxu3  ;;  %v2964_v28 = vor.u32 %v3564_v23, %v2961_v25  ;;  %v3671_v23 = vld [vmem:[%s5407_s11 + $0x34c] sm:$0xf] }
  0xc9   :  { %v762_v44 = vadd.f32 %v761_v35, %v164_v42  ;;  %v2953_v31 = vld [vmem:[%s5405_s9 + $0x68] sm:$0xf0]  ;;  %v3561_v35 = vld [vmem:[%s5405_s9 + $0x54] sm:$0xf0]  ;;  %1276 = vmatpush.bf16.msra.mxu1 %v2952_v32  ;;  %v3559_v42 = vld [vmem:[%s5405_s9 + $0x44] sm:$0xf0]  ;;  %v3392_v27 = vor.u32 %v3671_v23, %v3389_v24  ;;  %2038 = vmatpush.bf16.msrb.mxu2 %v3388_v26 }
  0xca   :  { %v845_v33 = vpack.c.bf16 %v843_v29, %v843_v29  ;;  %v3562_v29 = vld [vmem:[%s5405_s9 + $0x64] sm:$0xf]  ;;  %1288 = vmatpush.bf16.msra.mxu3 %v2964_v28  ;;  %v3107_v28 = vld [vmem:[%s5407_s11 + $0x118] sm:$0xf]  ;;  %v3569_v26 = vld [vmem:[%s5407_s11 + $0x18] sm:$0xf0] }
  0xcb   :  { %v774_v34 = vpop.f32.mrf.mxu2  ;;  %v737_v36 = vpop.f32.mrf.mxu1  ;;  %v3109_v32 = vld [vmem:[%s5407_s11 + $0x134] sm:$0xf0] }
  0xcc   :  { %987 = vmatmul.bf16.vlgmr.msrb.gmra.mxu1 %v845_v33  ;;  %v775_v46 = vadd.f32 %v774_v34, %v762_v44  ;;  %v2956_v33 = vor.u32 %v3562_v29, %v2953_v31  ;;  %v2943_v34 = vld [vmem:[%s5405_s9 + $0x50] sm:$0xf]  ;;  %v3560_v36 = vld [vmem:[%s5405_s9 + $0x54] sm:$0xf]  ;;  %v3558_v44 = vld [vmem:[%s5405_s9 + $0x44] sm:$0xf] }
  0xcd   :  { %v2944_v39 = vor.u32 %v3561_v35, %v2943_v34  ;;  %v3604_v29 = vld [vmem:[%s5407_s11 + $0x130] sm:$0xf0]  ;;  %v3601_v31 = vld [vmem:[%s5407_s11 + $0x11c] sm:$0xf]  ;;  %v3667_v34 = vld [vmem:[%s5407_s11 + $0x328] sm:$0xf0] }
  0xce   :  { %1289 = vmatpush.bf16.msra.mxu3 %v2956_v33  ;;  %v3359_v33 = vld [vmem:[%s5407_s11 + $0x310] sm:$0xf]  ;;  %v3219_v23 = vld [vmem:[%s5407_s11 + $0x1f8] sm:$0xf] }
  0xcf   :  { %1277 = vmatpush.bf16.msra.mxu1 %v2944_v39  ;;  %v3360_v35 = vor.u32 %v3667_v34, %v3359_v33  ;;  %v3108_v39 = vor.u32 %v3604_v29, %v3107_v28  ;;  %v3629_v28 = vld [vmem:[%s5407_s11 + $0x1fc] sm:$0xf]  ;;  %v3221_v29 = vld [vmem:[%s5407_s11 + $0x214] sm:$0xf0]  ;;  %v3566_v33 = vld [vmem:[%s5407_s11 + $0x4] sm:$0xf] }
  0xd0   :  { %v763_v41 = vpop.f32.mrf.mxu3  ;;  %v2969_v34 = vld [vmem:[%s5407_s11 + $0x1c] sm:$0xf0] }
  0xd1   :  { %v2935_v41 = vld [vmem:[%s5405_s9 + $0x40] sm:$0xf]  ;;  %2039 = vmatpush.bf16.msrb.mxu2 %v3360_v35  ;;  %v3171_v35 = vld [vmem:[%s5407_s11 + $0x190] sm:$0xf] }
  0xd3   :  { %v776_v40 = vpop.f32.mrf.mxu2 }
  0xd4   :  { %v2948_v40 = vor.u32 %v3560_v36, %v2945_v38  ;;  %v3664_v36 = vld [vmem:[%s5407_s11 + $0x314] sm:$0xf]  ;;  %v3361_v38 = vld [vmem:[%s5407_s11 + $0x32c] sm:$0xf0] }
  0xd6   :  { %1290 = vmatpush.bf16.msra.mxu3 %v2948_v40  ;;  %v3364_v40 = vor.u32 %v3664_v36, %v3361_v38  ;;  %v3619_v38 = vld [vmem:[%s5407_s11 + $0x1a8] sm:$0xf0] }
  0xe0   :  { %v787_v45 = vpop.f32.mrf.mxu0 }
  0xe1   :  { %v788_v48 = vadd.f32 %v787_v45, %v775_v46  ;;  %v2937_v45 = vld [vmem:[%s5405_s9 + $0x48] sm:$0xf0]  ;;  %v2936_v46 = vor.u32 %v3559_v42, %v2935_v41  ;;  %v3079_v41 = vld [vmem:[%s5407_s11 + $0xe0] sm:$0xf]  ;;  %v3597_v42 = vld [vmem:[%s5407_s11 + $0xf8] sm:$0xf0] }
  0xe3   :  { %v800_v47 = vpop.f32.mrf.mxu1  ;;  %1278 = vmatpush.bf16.msra.mxu1 %v2936_v46  ;;  %v3660_v46 = vld [vmem:[%s5407_s11 + $0x2f0] sm:$0xf0] }
  0xe4   :  { %v801_v52 = vadd.f32 %v800_v47, %v788_v48  ;;  %v2940_v47 = vor.u32 %v3558_v44, %v2937_v45  ;;  %v2927_v48 = vld [vmem:[%s5405_s9 + $0x30] sm:$0xf]  ;;  %v3112_v44 = vor.u32 %v3601_v31, %v3109_v32  ;;  %v3331_v45 = vld [vmem:[%s5407_s11 + $0x2d8] sm:$0xf] }
  0xe6   :  { %1291 = vmatpush.bf16.msra.mxu3 %v2940_v47  ;;  %v3657_v47 = vld [vmem:[%s5407_s11 + $0x2dc] sm:$0xf] }
  0xe8   :  { %v813_v49 = vpop.f32.mrf.mxu3  ;;  %v789_v50 = vpop.f32.mrf.mxu0 }
  0xe9   :  { %v814_v54 = vadd.f32 %v813_v49, %v801_v52  ;;  %v3557_v49 = vld [vmem:[%s5405_s9 + $0x34] sm:$0xf0]  ;;  %v3556_v50 = vld [vmem:[%s5405_s9 + $0x34] sm:$0xf]  ;;  %v2929_v52 = vld [vmem:[%s5405_s9 + $0x38] sm:$0xf0] }
  0xeb   :  { %v826_v53 = vpop.f32.mrf.mxu2  ;;  %v802_v55 = vpop.f32.mrf.mxu1 }
  0xec   :  { %v827_v56 = vadd.f32 %v826_v53, %v814_v54  ;;  %v2928_v53 = vor.u32 %v3557_v49, %v2927_v48  ;;  %v2932_v54 = vor.u32 %v3556_v50, %v2929_v52  ;;  %v2919_v55 = vld [vmem:[%s5405_s9 + $0x20] sm:$0xf]  ;;  %v3594_v48 = vld [vmem:[%s5407_s11 + $0xe4] sm:$0xf]  ;;  %v3333_v50 = vld [vmem:[%s5407_s11 + $0x2f4] sm:$0xf0]  ;;  %v3332_v52 = vor.u32 %v3660_v46, %v3331_v45 }
  0xed   :  { %v3081_v49 = vld [vmem:[%s5407_s11 + $0xfc] sm:$0xf0]  ;;  %v3625_v45 = vld [vmem:[%s5407_s11 + $0x1d8] sm:$0xf0]  ;;  %v3622_v46 = vld [vmem:[%s5407_s11 + $0x1c4] sm:$0xf] }
  0xee   :  { %1279 = vmatpush.bf16.msra.mxu1 %v2928_v53  ;;  %1292 = vmatpush.bf16.msra.mxu3 %v2932_v54  ;;  %v3336_v53 = vor.u32 %v3657_v47, %v3333_v50  ;;  %v3303_v54 = vld [vmem:[%s5407_s11 + $0x2a0] sm:$0xf] }
  0xef   :  { %2040 = vmatpush.bf16.msrb.mxu2 %v3332_v52  ;;  %v2972_v52 = vor.u32 %v3566_v33, %v2969_v34  ;;  %v3588_v33 = vld [vmem:[%s5407_s11 + $0xb4] sm:$0xf]  ;;  %v3061_v34 = vld [vmem:[%s5407_s11 + $0xcc] sm:$0xf0] }
  0xf0   :  { %v815_v57 = vpop.f32.mrf.mxu3  ;;  %v839_v59 = vpop.f32.mrf.mxu0 }
  0xf1   :  { %v840_v60 = vadd.f32 %v839_v59, %v827_v56  ;;  %v3555_v56 = vld [vmem:[%s5405_s9 + $0x24] sm:$0xf0]  ;;  %v3554_v57 = vld [vmem:[%s5405_s9 + $0x24] sm:$0xf]  ;;  %v2921_v59 = vld [vmem:[%s5405_s9 + $0x28] sm:$0xf0] }
  0xf3   :  { %v828_v61 = vpop.f32.mrf.mxu2  ;;  %v844_v62 = vmax.f32 %v840_v60, 0.0  ;;  %v2920_v60 = vor.u32 %v3555_v56, %v2919_v55  ;;  %v3080_v55 = vor.u32 %v3597_v42, %v3079_v41  ;;  %v3653_v56 = vld [vmem:[%s5407_s11 + $0x2b8] sm:$0xf0]  ;;  %v3224_v42 = vor.u32 %v3629_v28, %v3221_v29 }
  0xf4   :  { %v2924_v61 = vor.u32 %v3554_v57, %v2921_v59  ;;  %v3650_v57 = vld [vmem:[%s5407_s11 + $0x2a4] sm:$0xf]  ;;  %v3305_v59 = vld [vmem:[%s5407_s11 + $0x2bc] sm:$0xf0] }
  0xf5   :  { %v846_v63 = vpack.c.bf16 %v844_v62, %v844_v62  ;;  %v3681_v62 = vld [vmem:[%s5402_s6] ss:$0 sm:$0xff]  ;;  %1280 = vmatpush.bf16.msra.mxu1 %v2920_v60  ;;  %v3084_v60 = vor.u32 %v3594_v48, %v3081_v49  ;;  %v3395_v49 = vld [vmem:[%s5407_s11 + $0x350] sm:$0xf] }
  0xf6   :  { %1293 = vmatpush.bf16.msra.mxu3 %v2924_v61  ;;  %v3051_v61 = vld [vmem:[%s5407_s11 + $0xa8] sm:$0xf]  ;;  %v3193_v48 = vld [vmem:[%s5407_s11 + $0x1dc] sm:$0xf0] }
  0xf7   :  { %1000 = vmatmul.bf16.vlgmr.msrb.gmra.mxu3 %v846_v63 }
  0xf8   :  { %v841_v0 = vpop.f32.mrf.mxu0 }
  0xf9   :  { %1281 = vmatpush.bf16.msra.mxu1 %v2912_v37  ;;  %v3643_v37 = vld [vmem:[%s5407_s11 + $0x26c] sm:$0xf] }
  0xfd   :  { %1282 = vmatpush.bf16.msra.mxu1 %v2904_v7  ;;  %v3025_v7 = vld [vmem:[%s5407_s11 + $0x8c] sm:$0xf0] }
 0x149   :  { %v988_v2 = vpop.f32.mrf.mxu1 }
 0x14a   :  { %v989_v14 = vadd.f32 %v3680_v12, %v988_v2  ;;  %v2913_v2 = vld [vmem:[%s5405_s9 + $0x18] sm:$0xf0]  ;;  %v3615_v12 = vld [vmem:[%s5407_s11 + $0x18c] sm:$0xf]  ;;  %s2363_s9 = sshll.u32 %s3763_s21, 4  ;;  %s2364_s9 = int_to_ptr.vmem [resolvable:$true] %s2363_s9 }
 0x151   :  { %v990_v4 = vpop.f32.mrf.mxu1 }
 0x152   :  { %v2916_v4 = vor.u32 %v3552_v30, %v2913_v2  ;;  %v3646_v30 = vld [vmem:[%s5407_s11 + $0x280] sm:$0xf0]  ;;  %v3277_v2 = vld [vmem:[%s5407_s11 + $0x284] sm:$0xf0] }
 0x153   :  { %v3276_v8 = vor.u32 %v3646_v30, %v3275_v3 }
 0x154   :  { %1294 = vmatpush.bf16.msra.mxu3 %v2916_v4 }
 0x158   :  { %1295 = vmatpush.bf16.msra.mxu3 %v2908_v9  ;;  %v3280_v9 = vor.u32 %v3643_v37, %v3277_v2  ;;  %v3668_v37 = vld [vmem:[%s5407_s11 + $0x330] sm:$0xf0]  ;;  %v3665_v2 = vld [vmem:[%s5407_s11 + $0x31c] sm:$0xf] }
 0x15c   :  { %2064 = vmatpush.bf16.msrb.mxu3 %v3392_v27  ;;  %v3632_v27 = vld [vmem:[%s5407_s11 + $0x210] sm:$0xf0] }
 0x15d   :  { %v3220_v41 = vor.u32 %v3632_v27, %v3219_v23  ;;  %v3313_v27 = vld [vmem:[%s5407_s11 + $0x2c4] sm:$0xf0] }
 0x160   :  { %2065 = vmatpush.bf16.msrb.mxu3 %v3364_v40  ;;  %v3173_v40 = vld [vmem:[%s5407_s11 + $0x1ac] sm:$0xf0] }
 0x164   :  { %2066 = vmatpush.bf16.msrb.mxu3 %v3336_v53  ;;  %v3675_v53 = vld [vmem:[%s5407_s11 + $0x368] sm:$0xf0] }
 0x17a   :  { %v1001_v15 = vpop.f32.mrf.mxu3 }
 0x17b   :  { %v1002_v16 = vadd.f32 %v1001_v15, %v989_v14  ;;  %v3165_v14 = vld [vmem:[%s5407_s11 + $0x1a4] sm:$0xf0]  ;;  %v3135_v15 = vld [vmem:[%s5407_s11 + $0x150] sm:$0xf] }
 0x17d   :  { %v1005_v17 = vmax.f32 %v1002_v16, 0.0  ;;  %v3611_v16 = vld [vmem:[%s5407_s11 + $0x168] sm:$0xf0] }
 0x17e   :  { %v3136_v21 = vor.u32 %v3611_v16, %v3135_v15  ;;  %v3028_v15 = vor.u32 %v3580_v6, %v3025_v7  ;;  %v2995_v16 = vld [vmem:[%s5407_s11 + $0x38] sm:$0xf]  ;;  %v3115_v6 = vld [vmem:[%s5407_s11 + $0x120] sm:$0xf]  ;;  %v3605_v7 = vld [vmem:[%s5407_s11 + $0x138] sm:$0xf0] }
 0x17f   :  { %v1006_v18 = vpack.c.bf16 %v1005_v17, %v1005_v17  ;;  %v3168_v17 = vor.u32 %v3615_v12, %v3165_v14  ;;  %v3639_v12 = vld [vmem:[%s5407_s11 + $0x248] sm:$0xf0]  ;;  %v3249_v14 = vld [vmem:[%s5407_s11 + $0x24c] sm:$0xf0] }
 0x180   :  { %2026 = vmatpush.bf16.msrb.mxu0 %v3136_v21  ;;  %v3248_v21 = vor.u32 %v3639_v12, %v3247_v10  ;;  %v3252_v22 = vor.u32 %v3636_v13, %v3249_v14  ;;  %v3339_v12 = vld [vmem:[%s5407_s11 + $0x2e0] sm:$0xf]  ;;  %v3661_v13 = vld [vmem:[%s5407_s11 + $0x2f8] sm:$0xf0]  ;;  %v3658_v14 = vld [vmem:[%s5407_s11 + $0x2e4] sm:$0xf] }
 0x181   :  { %1083 = vmatmul.bf16.vlgmr.msra.gmra.mxu0 %v1006_v18  ;;  %v3608_v18 = vld [vmem:[%s5407_s11 + $0x154] sm:$0xf]  ;;  %2051 = vmatpush.bf16.msrb.mxu1 %v3168_v17 }
 0x182   :  { %v1003_v19 = vpop.f32.mrf.mxu3  ;;  %v3576_v17 = vld [vmem:[%s5407_s11 + $0x50] sm:$0xf0] }
 0x183   :  { %v3137_v19 = vld [vmem:[%s5407_s11 + $0x16c] sm:$0xf0]  ;;  %v2996_v24 = vor.u32 %v3576_v17, %v2995_v16  ;;  %v3116_v16 = vor.u32 %v3605_v7, %v3115_v6  ;;  %v3630_v7 = vld [vmem:[%s5407_s11 + $0x204] sm:$0xf] }
 0x184   :  { %v3140_v25 = vor.u32 %v3608_v18, %v3137_v19  ;;  %2027 = vmatpush.bf16.msrb.mxu0 %v3108_v39  ;;  %v3682_v18 = vld [vmem:[%s5404_s8] ss:$0 sm:$0xff]  ;;  %v3573_v19 = vld [vmem:[%s5407_s11 + $0x3c] sm:$0xf]  ;;  %v3616_v39 = vld [vmem:[%s5407_s11 + $0x194] sm:$0xf] }
 0x185   :  { %v3000_v32 = vor.u32 %v3573_v19, %v2997_v20  ;;  %v3598_v19 = vld [vmem:[%s5407_s11 + $0x100] sm:$0xf0]  ;;  %v3595_v20 = vld [vmem:[%s5407_s11 + $0xec] sm:$0xf] }
 0x186   :  { %2052 = vmatpush.bf16.msrb.mxu1 %v3140_v25  ;;  %v2967_v25 = vld [vmem:[%s5407_s11] sm:$0xf] }
 0x187   :  { %v2968_v50 = vor.u32 %v3569_v26, %v2967_v25  ;;  %v3654_v25 = vld [vmem:[%s5407_s11 + $0x2c0] sm:$0xf0]  ;;  %v3651_v26 = vld [vmem:[%s5407_s11 + $0x2ac] sm:$0xf] }
 0x188   :  { %2028 = vmatpush.bf16.msrb.mxu0 %v3080_v55  ;;  %v3397_v55 = vld [vmem:[%s5407_s11 + $0x36c] sm:$0xf0] }
 0x18a   :  { %2053 = vmatpush.bf16.msrb.mxu1 %v3112_v44  ;;  %v3191_v44 = vld [vmem:[%s5407_s11 + $0x1c0] sm:$0xf] }
 0x18e   :  { %2054 = vmatpush.bf16.msrb.mxu1 %v3084_v60  ;;  %v3143_v60 = vld [vmem:[%s5407_s11 + $0x158] sm:$0xf] }
 0x1fe   :  { %v1084_v63 = vpop.f32.mrf.mxu0 }
 0x1ff   :  { %v1085_v0 = vadd.f32 %v3681_v62, %v1084_v63  ;;  %v3590_v62 = vld [vmem:[%s5407_s11 + $0xc0] sm:$0xf0]  ;;  %v3587_v63 = vld [vmem:[%s5407_s11 + $0xac] sm:$0xf] }
 0x200   :  { %v3052_v43 = vor.u32 %v3590_v62, %v3051_v61  ;;  %v3612_v61 = vld [vmem:[%s5407_s11 + $0x170] sm:$0xf0]  ;;  %v3192_v62 = vor.u32 %v3625_v45, %v3191_v44  ;;  %v3033_v44 = vld [vmem:[%s5407_s11 + $0x94] sm:$0xf0] }
 0x201   :  { %1088 = vst [vmem:[#allocation4] sm:$0xff] %v1085_v0  ;;  %v1089_v1 = vpack.c.bf16 %v1085_v0, %v1085_v0  ;;  %v3053_v0 = vld [vmem:[%s5407_s11 + $0xc4] sm:$0xf0]  ;;  %v3144_v58 = vor.u32 %v3612_v61, %v3143_v60  ;;  %v3255_v61 = vld [vmem:[%s5407_s11 + $0x238] sm:$0xf] }
 0x202   :  { %v3056_v4 = vor.u32 %v3587_v63, %v3053_v0  ;;  %2029 = vmatpush.bf16.msrb.mxu0 %v3052_v43  ;;  %v3609_v63 = vld [vmem:[%s5407_s11 + $0x15c] sm:$0xf]  ;;  %v3145_v0 = vld [vmem:[%s5407_s11 + $0x174] sm:$0xf0]  ;;  %2368 = dma.vmem_to_hbm [thread:$0]  %s2364_s9, 128, %s2366_s0, [#allocation5]  }
 0x203   :  { %1166 = vmatmul.bf16.vlgmr.msra.gmra.mxu2 %v1089_v1  ;;  %v3304_v1 = vor.u32 %v3653_v56, %v3303_v54  ;;  %v3672_v54 = vld [vmem:[%s5407_s11 + $0x354] sm:$0xf]  ;;  %v3367_v43 = vld [vmem:[%s5407_s11 + $0x318] sm:$0xf]  ;;  %v3148_v5 = vor.u32 %v3609_v63, %v3145_v0  ;;  %v3637_v0 = vld [vmem:[%s5407_s11 + $0x23c] sm:$0xf] }
 0x204   :  { %2055 = vmatpush.bf16.msrb.mxu1 %v3056_v4  ;;  %v3400_v3 = vor.u32 %v3672_v54, %v3397_v55  ;;  %v3369_v4 = vld [vmem:[%s5407_s11 + $0x334] sm:$0xf0]  ;;  %v3368_v10 = vor.u32 %v3668_v37, %v3367_v43  ;;  %v3003_v54 = vld [vmem:[%s5407_s11 + $0x40] sm:$0xf]  ;;  %v3577_v55 = vld [vmem:[%s5407_s11 + $0x58] sm:$0xf0] }
 0x205   :  { %2041 = vmatpush.bf16.msrb.mxu2 %v3304_v1  ;;  %v3196_v1 = vor.u32 %v3622_v46, %v3193_v48  ;;  %v3647_v48 = vld [vmem:[%s5407_s11 + $0x288] sm:$0xf0]  ;;  %v3570_v43 = vld [vmem:[%s5407_s11 + $0x20] sm:$0xf0] }
 0x206   :  { %v1086_v51 = vpop.f32.mrf.mxu0  ;;  %2030 = vmatpush.bf16.msrb.mxu0 %v3024_v11  ;;  %v3372_v11 = vor.u32 %v3665_v2, %v3369_v4  ;;  %v3567_v37 = vld [vmem:[%s5407_s11 + $0xc] sm:$0xf]  ;;  %v2977_v2 = vld [vmem:[%s5407_s11 + $0x24] sm:$0xf0] }
 0x207   :  { %v3308_v51 = vor.u32 %v3650_v57, %v3305_v59  ;;  %v3172_v57 = vor.u32 %v3619_v38, %v3171_v35  ;;  %v3176_v59 = vor.u32 %v3616_v39, %v3173_v40  ;;  %v3064_v39 = vor.u32 %v3588_v33, %v3061_v34  ;;  %v3031_v40 = vld [vmem:[%s5407_s11 + $0x78] sm:$0xf]  ;;  %v3153_v33 = vld [vmem:[%s5407_s11 + $0x17c] sm:$0xf0] }
 0x208   :  { %2056 = vmatpush.bf16.msrb.mxu1 %v3028_v15  ;;  %v3341_v15 = vld [vmem:[%s5407_s11 + $0x2fc] sm:$0xf0]  ;;  %v2980_v4 = vor.u32 %v3567_v37, %v2977_v2  ;;  %v3659_v37 = vld [vmem:[%s5407_s11 + $0x2ec] sm:$0xf]  ;;  %v3349_v2 = vld [vmem:[%s5407_s11 + $0x304] sm:$0xf0] }
 0x209   :  { %2067 = vmatpush.bf16.msrb.mxu3 %v3308_v51  ;;  %2042 = vmatpush.bf16.msrb.mxu2 %v3276_v8  ;;  %v3396_v51 = vor.u32 %v3675_v53, %v3395_v49  ;;  %v3602_v8 = vld [vmem:[%s5407_s11 + $0x124] sm:$0xf]  ;;  %v3344_v23 = vor.u32 %v3658_v14, %v3341_v15  ;;  %v3201_v14 = vld [vmem:[%s5407_s11 + $0x1e4] sm:$0xf0] }
 0x20a   :  { %2031 = vmatpush.bf16.msrb.mxu0 %v2996_v24  ;;  %v3311_v24 = vld [vmem:[%s5407_s11 + $0x2a8] sm:$0xf] }
 0x20b   :  { %v3312_v35 = vor.u32 %v3654_v25, %v3311_v24 }
 0x20c   :  { %2057 = vmatpush.bf16.msrb.mxu1 %v3000_v32  ;;  %v3591_v32 = vld [vmem:[%s5407_s11 + $0xc8] sm:$0xf0] }
 0x20d   :  { %2068 = vmatpush.bf16.msrb.mxu3 %v3280_v9  ;;  %2043 = vmatpush.bf16.msrb.mxu2 %v3248_v21  ;;  %v3117_v9 = vld [vmem:[%s5407_s11 + $0x13c] sm:$0xf0]  ;;  %v3089_v21 = vld [vmem:[%s5407_s11 + $0x104] sm:$0xf0] }
 0x20e   :  { %2032 = vmatpush.bf16.msrb.mxu0 %v2968_v50  ;;  %v3120_v17 = vor.u32 %v3602_v8, %v3117_v9  ;;  %v3092_v29 = vor.u32 %v3595_v20, %v3089_v21  ;;  %v3644_v50 = vld [vmem:[%s5407_s11 + $0x274] sm:$0xf]  ;;  %v3229_v8 = vld [vmem:[%s5407_s11 + $0x21c] sm:$0xf0] }
 0x20f   :  { %v3232_v9 = vor.u32 %v3630_v7, %v3229_v8  ;;  %v3620_v21 = vld [vmem:[%s5407_s11 + $0x1b0] sm:$0xf0]  ;;  %v3589_v7 = vld [vmem:[%s5407_s11 + $0xbc] sm:$0xf]  ;;  %v3069_v8 = vld [vmem:[%s5407_s11 + $0xd4] sm:$0xf0] }
 0x210   :  { %2058 = vmatpush.bf16.msrb.mxu1 %v2972_v52  ;;  %v3285_v52 = vld [vmem:[%s5407_s11 + $0x28c] sm:$0xf0] }
 0x211   :  { %2069 = vmatpush.bf16.msrb.mxu3 %v3252_v22  ;;  %2044 = vmatpush.bf16.msrb.mxu2 %v3220_v41  ;;  %v3340_v22 = vor.u32 %v3661_v13, %v3339_v12  ;;  %v3584_v41 = vld [vmem:[%s5407_s11 + $0x90] sm:$0xf0]  ;;  %v3288_v53 = vor.u32 %v3644_v50, %v3285_v52  ;;  %v3623_v13 = vld [vmem:[%s5407_s11 + $0x1cc] sm:$0xf] }
 0x212   :  { %2077 = vmatpush.bf16.msra.mxu0 %v3172_v57  ;;  %v3032_v45 = vor.u32 %v3584_v41, %v3031_v40  ;;  %v3574_v57 = vld [vmem:[%s5407_s11 + $0x44] sm:$0xf]  ;;  %v3204_v15 = vor.u32 %v3623_v13, %v3201_v14  ;;  %v3405_v40 = vld [vmem:[%s5407_s11 + $0x374] sm:$0xf0]  ;;  %v3652_v13 = vld [vmem:[%s5407_s11 + $0x2b4] sm:$0xf] }
 0x213   :  { %v3321_v14 = vld [vmem:[%s5407_s11 + $0x2cc] sm:$0xf0] }
 0x215   :  { %2070 = vmatpush.bf16.msrb.mxu3 %v3224_v42  ;;  %2045 = vmatpush.bf16.msrb.mxu2 %v3192_v62  ;;  %v3581_v42 = vld [vmem:[%s5407_s11 + $0x7c] sm:$0xf]  ;;  %v3640_v62 = vld [vmem:[%s5407_s11 + $0x250] sm:$0xf0] }
 0x216   :  { %2078 = vmatpush.bf16.msra.mxu0 %v3144_v58  ;;  %v3036_v46 = vor.u32 %v3581_v42, %v3033_v44  ;;  %v3256_v63 = vor.u32 %v3640_v62, %v3255_v61  ;;  %v3227_v58 = vld [vmem:[%s5407_s11 + $0x200] sm:$0xf]  ;;  %v3095_v61 = vld [vmem:[%s5407_s11 + $0xf0] sm:$0xf]  ;;  %v3599_v62 = vld [vmem:[%s5407_s11 + $0x108] sm:$0xf0] }
 0x219   :  { %2071 = vmatpush.bf16.msrb.mxu3 %v3196_v1  ;;  %2090 = vmatpush.bf16.msra.mxu2 %v3396_v51  ;;  %v3257_v1 = vld [vmem:[%s5407_s11 + $0x254] sm:$0xf0] }
 0x21a   :  { %2079 = vmatpush.bf16.msra.mxu0 %v3116_v16  ;;  %v3260_v51 = vor.u32 %v3637_v0, %v3257_v1  ;;  %v1189_v16 = vld [vmem:[%s5406_s10] sm:$0x3]  ;;  %v3097_v0 = vld [vmem:[%s5407_s11 + $0x10c] sm:$0xf0] }
 0x21b   :  { %v1192_v25 = vperm.slane %v1189_v16, 1 }
 0x21d   :  { %2091 = vmatpush.bf16.msra.mxu2 %v3368_v10  ;;  %v3199_v10 = vld [vmem:[%s5407_s11 + $0x1c8] sm:$0xf] }
 0x221   :  { %2092 = vmatpush.bf16.msra.mxu2 %v3340_v22  ;;  %v3617_v22 = vld [vmem:[%s5407_s11 + $0x19c] sm:$0xf] }
 0x225   :  { %2093 = vmatpush.bf16.msra.mxu2 %v3312_v35  ;;  %v3403_v35 = vld [vmem:[%s5407_s11 + $0x358] sm:$0xf] }
 0x286   :  { %v1167_v31 = vpop.f32.mrf.mxu2 }
 0x287   :  { %v1168_v36 = vadd.f32 %v3682_v18, %v1167_v31  ;;  %v3087_v18 = vld [vmem:[%s5407_s11 + $0xe8] sm:$0xf]  ;;  %v3059_v31 = vld [vmem:[%s5407_s11 + $0xb0] sm:$0xf] }
 0x288   :  { %v3088_v28 = vor.u32 %v3598_v19, %v3087_v18  ;;  %v3060_v38 = vor.u32 %v3591_v32, %v3059_v31  ;;  %v3179_v19 = vld [vmem:[%s5407_s11 + $0x198] sm:$0xf]  ;;  %v3613_v31 = vld [vmem:[%s5407_s11 + $0x178] sm:$0xf0]  ;;  %v3610_v32 = vld [vmem:[%s5407_s11 + $0x164] sm:$0xf] }
 0x289   :  { %v1171_v47 = vmax.f32 %v1168_v36, 0.0  ;;  %v3316_v36 = vor.u32 %v3651_v26, %v3313_v27  ;;  %v3180_v26 = vor.u32 %v3620_v21, %v3179_v19  ;;  %v3156_v44 = vor.u32 %v3610_v32, %v3153_v33  ;;  %v3582_v19 = vld [vmem:[%s5407_s11 + $0x84] sm:$0xf]  ;;  %v3575_v33 = vld [vmem:[%s5407_s11 + $0x4c] sm:$0xf] }
 0x28a   :  { %2080 = vmatpush.bf16.msra.mxu0 %v3088_v28  ;;  %v3151_v28 = vld [vmem:[%s5407_s11 + $0x160] sm:$0xf]  ;;  %v3578_v32 = vld [vmem:[%s5407_s11 + $0x60] sm:$0xf0] }
 0x28b   :  { %v1172_v56 = vpack.c.bf16 %v1171_v47, %v1171_v47  ;;  %v3283_v47 = vld [vmem:[%s5407_s11 + $0x270] sm:$0xf]  ;;  %v3152_v42 = vor.u32 %v3613_v31, %v3151_v28  ;;  %v3011_v31 = vld [vmem:[%s5407_s11 + $0x48] sm:$0xf] }
 0x28c   :  { %v3284_v49 = vor.u32 %v3647_v48, %v3283_v47  ;;  %v3603_v48 = vld [vmem:[%s5407_s11 + $0x12c] sm:$0xf] }
 0x28d   :  { %1283 = vmatmul.bf16.vlgmr.msra.gmra.mxu1 %v1172_v56  ;;  %1296 = vmatmul.bf16.vlgmr.msra.gmra.mxu3 %v1172_v56  ;;  %v3004_v56 = vor.u32 %v3577_v55, %v3003_v54  ;;  %v3669_v55 = vld [vmem:[%s5407_s11 + $0x338] sm:$0xf0] }
 0x28e   :  { %v1169_v30 = vpop.f32.mrf.mxu2  ;;  %2103 = vmatpush.bf16.msra.mxu1 %v3176_v59  ;;  %2116 = vmatpush.bf16.msra.mxu3 %v3400_v3  ;;  %v3005_v59 = vld [vmem:[%s5407_s11 + $0x5c] sm:$0xf0]  ;;  %v2975_v3 = vld [vmem:[%s5407_s11 + $0x8] sm:$0xf] }
 0x28f   :  { %2081 = vmatpush.bf16.msra.mxu0 %v3060_v38  ;;  %2094 = vmatpush.bf16.msra.mxu2 %v3284_v49  ;;  %v3008_v60 = vor.u32 %v3574_v57, %v3005_v59  ;;  %v2976_v30 = vor.u32 %v3570_v43, %v2975_v3  ;;  %v3676_v38 = vld [vmem:[%s5407_s11 + $0x370] sm:$0xf0]  ;;  %v3125_v49 = vld [vmem:[%s5407_s11 + $0x144] sm:$0xf0]  ;;  %v3377_v57 = vld [vmem:[%s5407_s11 + $0x33c] sm:$0xf0] }
 0x290   :  { %v3404_v50 = vor.u32 %v3676_v38, %v3403_v35  ;;  %v3347_v43 = vld [vmem:[%s5407_s11 + $0x2e8] sm:$0xf]  ;;  %v3263_v38 = vld [vmem:[%s5407_s11 + $0x240] sm:$0xf] }
 0x292   :  { %2104 = vmatpush.bf16.msra.mxu1 %v3148_v5  ;;  %2117 = vmatpush.bf16.msra.mxu3 %v3372_v11  ;;  %v3633_v5 = vld [vmem:[%s5407_s11 + $0x218] sm:$0xf0]  ;;  %v3626_v11 = vld [vmem:[%s5407_s11 + $0x1e0] sm:$0xf0] }
 0x293   :  { %2082 = vmatpush.bf16.msra.mxu0 %v3032_v45  ;;  %2095 = vmatpush.bf16.msra.mxu2 %v3256_v63  ;;  %v3228_v6 = vor.u32 %v3633_v5, %v3227_v58  ;;  %v3200_v12 = vor.u32 %v3626_v11, %v3199_v10  ;;  %v3123_v45 = vld [vmem:[%s5407_s11 + $0x128] sm:$0xf]  ;;  %v3596_v63 = vld [vmem:[%s5407_s11 + $0xf4] sm:$0xf]  ;;  %v3067_v5 = vld [vmem:[%s5407_s11 + $0xb8] sm:$0xf]  ;;  %v3352_v10 = vor.u32 %v3659_v37, %v3349_v2 }
 0x294   :  { %v3100_v58 = vor.u32 %v3596_v63, %v3097_v0  ;;  %v3319_v11 = vld [vmem:[%s5407_s11 + $0x2b0] sm:$0xf]  ;;  %v3411_v2 = vld [vmem:[%s5407_s11 + $0x360] sm:$0xf] }
 0x295   :  { %v3209_v37 = vld [vmem:[%s5407_s11 + $0x1ec] sm:$0xf0] }
 0x296   :  { %2105 = vmatpush.bf16.msra.mxu1 %v3120_v17  ;;  %2118 = vmatpush.bf16.msra.mxu3 %v3344_v23  ;;  %v1191_v17 = vperm.slane %v1189_v16, 0  ;;  %v3181_v23 = vld [vmem:[%s5407_s11 + $0x1b4] sm:$0xf0]  ;;  %v3072_v16 = vor.u32 %v3589_v7, %v3069_v8  ;;  %v3131_v7 = vld [vmem:[%s5407_s11 + $0x130] sm:$0xf] }
 0x297   :  { %2083 = vmatpush.bf16.msra.mxu0 %v3004_v56  ;;  %2096 = vmatpush.bf16.msra.mxu2 %v3228_v6  ;;  %v3184_v27 = vor.u32 %v3617_v22, %v3181_v23  ;;  %v3666_v56 = vld [vmem:[%s5407_s11 + $0x324] sm:$0xf]  ;;  %v3592_v6 = vld [vmem:[%s5407_s11 + $0xd0] sm:$0xf0]  ;;  %v3324_v22 = vor.u32 %v3652_v13, %v3321_v14  ;;  %v3291_v23 = vld [vmem:[%s5407_s11 + $0x278] sm:$0xf] }
 0x298   :  { %v3380_v3 = vor.u32 %v3666_v56, %v3377_v57  ;;  %v3634_v56 = vld [vmem:[%s5407_s11 + $0x220] sm:$0xf0]  ;;  %v3631_v57 = vld [vmem:[%s5407_s11 + $0x20c] sm:$0xf]  ;;  %v3103_v13 = vld [vmem:[%s5407_s11 + $0xf8] sm:$0xf] }
 0x299   :  { %v3607_v8 = vld [vmem:[%s5407_s11 + $0x148] sm:$0xf0]  ;;  %v3600_v14 = vld [vmem:[%s5407_s11 + $0x110] sm:$0xf0] }
 0x29a   :  { %2106 = vmatpush.bf16.msra.mxu1 %v3092_v29  ;;  %2119 = vmatpush.bf16.msra.mxu3 %v3316_v36 }
 0x29b   :  { %2084 = vmatpush.bf16.msra.mxu0 %v2976_v30  ;;  %2097 = vmatpush.bf16.msra.mxu2 %v3200_v12  ;;  %v3662_v30 = vld [vmem:[%s5407_s11 + $0x300] sm:$0xf0]  ;;  %v3655_v12 = vld [vmem:[%s5407_s11 + $0x2c8] sm:$0xf0] }
 0x29c   :  { %v3320_v21 = vor.u32 %v3655_v12, %v3319_v11  ;;  %v3670_v11 = vld [vmem:[%s5407_s11 + $0x340] sm:$0xf0]  ;;  %v3132_v12 = vor.u32 %v3607_v8, %v3131_v7 }
 0x29e   :  { %2107 = vmatpush.bf16.msra.mxu1 %v3064_v39  ;;  %2120 = vmatpush.bf16.msra.mxu3 %v3288_v53  ;;  %v3673_v39 = vld [vmem:[%s5407_s11 + $0x35c] sm:$0xf]  ;;  %v3375_v53 = vld [vmem:[%s5407_s11 + $0x320] sm:$0xf] }
 0x29f   :  { %v3408_v52 = vor.u32 %v3673_v39, %v3405_v40  ;;  %v3641_v39 = vld [vmem:[%s5407_s11 + $0x258] sm:$0xf0]  ;;  %v3638_v40 = vld [vmem:[%s5407_s11 + $0x244] sm:$0xf] }
 0x2a2   :  { %2108 = vmatpush.bf16.msra.mxu1 %v3036_v46  ;;  %2121 = vmatpush.bf16.msra.mxu3 %v3260_v51  ;;  %v3606_v46 = vld [vmem:[%s5407_s11 + $0x140] sm:$0xf0]  ;;  %v3376_v51 = vor.u32 %v3669_v55, %v3375_v53  ;;  %v3621_v53 = vld [vmem:[%s5407_s11 + $0x1b8] sm:$0xf0]  ;;  %v3235_v55 = vld [vmem:[%s5407_s11 + $0x208] sm:$0xf] }
 0x2a3   :  { %v3124_v59 = vor.u32 %v3606_v46, %v3123_v45  ;;  %v2983_v45 = vld [vmem:[%s5407_s11 + $0x10] sm:$0xf]  ;;  %v3571_v46 = vld [vmem:[%s5407_s11 + $0x28] sm:$0xf0]  ;;  %v3236_v63 = vor.u32 %v3634_v56, %v3235_v55  ;;  %v5382_v55 = vld [vmem:[%s5408_s12] sm:$0x7f] }
 0x2a4   :  { %s3764_s12 = smov [#allocation2]  }
 0x2a5   :  { %s2352_s14 = sshll.u32 %s3764_s12, 4  ;;  %s2353_s14 = int_to_ptr.vmem [resolvable:$true] %s2352_s14 }
 0x2a6   :  { %2109 = vmatpush.bf16.msra.mxu1 %v3008_v60  ;;  %2122 = vmatpush.bf16.msra.mxu3 %v3232_v9  ;;  %v3128_v60 = vor.u32 %v3603_v48, %v3125_v49  ;;  %v3348_v9 = vor.u32 %v3662_v30, %v3347_v43  ;;  %v2985_v48 = vld [vmem:[%s5407_s11 + $0x2c] sm:$0xf0]  ;;  %v3264_v49 = vor.u32 %v3641_v39, %v3263_v38  ;;  %v3627_v43 = vld [vmem:[%s5407_s11 + $0x1e8] sm:$0xf0]  ;;  %v3624_v30 = vld [vmem:[%s5407_s11 + $0x1d4] sm:$0xf] }
 0x2a7   :  { %v3642_v38 = vld [vmem:[%s5407_s11 + $0x260] sm:$0xf0] }
 0x2aa   :  { %2110 = vmatpush.bf16.msra.mxu1 %v2980_v4  ;;  %2123 = vmatpush.bf16.msra.mxu3 %v3204_v15  ;;  %v3096_v4 = vor.u32 %v3599_v62, %v3095_v61  ;;  %v3068_v15 = vor.u32 %v3592_v6, %v3067_v5  ;;  %v3212_v6 = vor.u32 %v3624_v30, %v3209_v37 }
 0x30a   :  { %v1284_v18 = vpop.f32.mrf.mxu1 }
 0x30b   :  { %v1285_v20 = vadd.f32 %v1284_v18, %v1191_v17  ;;  %v3039_v17 = vld [vmem:[%s5407_s11 + $0x80] sm:$0xf]  ;;  %v3585_v18 = vld [vmem:[%s5407_s11 + $0x98] sm:$0xf0] }
 0x30d   :  { %v1301_v24 = vmax.f32 %v1285_v20, 0.0  ;;  %v3041_v20 = vld [vmem:[%s5407_s11 + $0x9c] sm:$0xf0] }
 0x30e   :  { %v3044_v28 = vor.u32 %v3582_v19, %v3041_v20  ;;  %v3075_v19 = vld [vmem:[%s5407_s11 + $0xc0] sm:$0xf]  ;;  %v3593_v20 = vld [vmem:[%s5407_s11 + $0xd8] sm:$0xf0] }
 0x30f   :  { %v5085_v29 = vpack.c.bf16 %v1301_v24, %v1301_v24  ;;  %v3648_v24 = vld [vmem:[%s5407_s11 + $0x290] sm:$0xf0] }
 0x310   :  { %v1297_v34 = vpop.f32.mrf.mxu3  ;;  %v3292_v35 = vor.u32 %v3648_v24, %v3291_v23  ;;  %v3656_v23 = vld [vmem:[%s5407_s11 + $0x2d0] sm:$0xf0]  ;;  %v3076_v24 = vor.u32 %v3593_v20, %v3075_v19 }
 0x311   :  { %v1298_v36 = vadd.f32 %v1297_v34, %v1192_v25  ;;  %2033 = vmatmul.bf16.vlgmr.msrb.gmra.mxu0 %v5085_v29  ;;  %2059 = vmatmul.bf16.vlgmr.msrb.gmra.mxu1 %v5085_v29  ;;  %v3645_v25 = vld [vmem:[%s5407_s11 + $0x27c] sm:$0xf]  ;;  %v3013_v34 = vld [vmem:[%s5407_s11 + $0x64] sm:$0xf0] }
 0x312   :  { %2129 = vmatpush.bf16.msrb.mxu0 %v3180_v26  ;;  %v1286_v41 = vpop.f32.mrf.mxu1  ;;  %2155 = vmatpush.bf16.msrb.mxu1 %v3184_v27  ;;  %v3293_v26 = vld [vmem:[%s5407_s11 + $0x294] sm:$0xf0]  ;;  %v3040_v27 = vor.u32 %v3585_v18, %v3039_v17  ;;  %v3663_v17 = vld [vmem:[%s5407_s11 + $0x308] sm:$0xf0]  ;;  %v3104_v18 = vor.u32 %v3600_v14, %v3103_v13 }
 0x313   :  { %v1302_v47 = vmax.f32 %v1298_v36, 0.0  ;;  %v3296_v36 = vor.u32 %v3645_v25, %v3293_v26  ;;  %v3265_v41 = vld [vmem:[%s5407_s11 + $0x25c] sm:$0xf0]  ;;  %v3047_v25 = vld [vmem:[%s5407_s11 + $0x88] sm:$0xf] }
 0x314   :  { %v3586_v26 = vld [vmem:[%s5407_s11 + $0xa0] sm:$0xf0] }
 0x315   :  { %v5125_v54 = vpack.c.bf16 %v1302_v47, %v1302_v47  ;;  %v3568_v47 = vld [vmem:[%s5407_s11 + $0x14] sm:$0xf] }
 0x316   :  { %2130 = vmatpush.bf16.msrb.mxu0 %v3152_v42  ;;  %2156 = vmatpush.bf16.msrb.mxu1 %v3156_v44  ;;  %v3012_v42 = vor.u32 %v3578_v32, %v3011_v31  ;;  %v3016_v44 = vor.u32 %v3575_v33, %v3013_v34  ;;  %v2988_v61 = vor.u32 %v3568_v47, %v2985_v48  ;;  %v3649_v31 = vld [vmem:[%s5407_s11 + $0x298] sm:$0xf0]  ;;  %v3019_v33 = vld [vmem:[%s5407_s11 + $0x50] sm:$0xf]  ;;  %v3579_v34 = vld [vmem:[%s5407_s11 + $0x68] sm:$0xf0] }
 0x317   :  { %2046 = vmatmul.bf16.vlgmr.msrb.gmra.mxu2 %v5125_v54  ;;  %2072 = vmatmul.bf16.vlgmr.msrb.gmra.mxu3 %v5125_v54  ;;  %v3048_v32 = vor.u32 %v3586_v26, %v3047_v25  ;;  %v3020_v39 = vor.u32 %v3579_v34, %v3019_v33  ;;  %v3215_v48 = vld [vmem:[%s5407_s11 + $0x1d8] sm:$0xf] }
 0x318   :  { %2142 = vmatpush.bf16.msrb.mxu2 %v3404_v50  ;;  %v1299_v1 = vpop.f32.mrf.mxu3  ;;  %2168 = vmatpush.bf16.msrb.mxu3 %v3408_v52  ;;  %v3268_v50 = vor.u32 %v3638_v40, %v3265_v41  ;;  %v3187_v52 = vld [vmem:[%s5407_s11 + $0x1a0] sm:$0xf]  ;;  %v2991_v40 = vld [vmem:[%s5407_s11 + $0x18] sm:$0xf]  ;;  %v3572_v41 = vld [vmem:[%s5407_s11 + $0x30] sm:$0xf0] }
 0x319   :  { %v3188_v62 = vor.u32 %v3621_v53, %v3187_v52  ;;  %v3159_v1 = vld [vmem:[%s5407_s11 + $0x168] sm:$0xf] }
 0x31a   :  { %2131 = vmatpush.bf16.msrb.mxu0 %v3124_v59  ;;  %2157 = vmatpush.bf16.msrb.mxu1 %v3128_v60  ;;  %v3237_v59 = vld [vmem:[%s5407_s11 + $0x224] sm:$0xf0]  ;;  %v2984_v60 = vor.u32 %v3571_v46, %v2983_v45  ;;  %v3635_v45 = vld [vmem:[%s5407_s11 + $0x228] sm:$0xf0]  ;;  %v2992_v46 = vor.u32 %v3572_v41, %v2991_v40  ;;  %v1440_v40 = vperm.slane %v5382_v55, 5 }
 0x31b   :  { %v3240_v0 = vor.u32 %v3631_v57, %v3237_v59 }
 0x31c   :  { %2143 = vmatpush.bf16.msrb.mxu2 %v3376_v51  ;;  %2169 = vmatpush.bf16.msrb.mxu3 %v3380_v3  ;;  %v3614_v51 = vld [vmem:[%s5407_s11 + $0x180] sm:$0xf0]  ;;  %v3207_v3 = vld [vmem:[%s5407_s11 + $0x1d0] sm:$0xf] }
 0x31d   :  { %v3208_v5 = vor.u32 %v3627_v43, %v3207_v3 }
 0x31e   :  { %2132 = vmatpush.bf16.msrb.mxu0 %v3096_v4  ;;  %2158 = vmatpush.bf16.msrb.mxu1 %v3100_v58  ;;  %v3677_v4 = vld [vmem:[%s5407_s11 + $0x378] sm:$0xf0]  ;;  %v3160_v58 = vor.u32 %v3614_v51, %v3159_v1 }
 0x320   :  { %2144 = vmatpush.bf16.msrb.mxu2 %v3348_v9  ;;  %2170 = vmatpush.bf16.msrb.mxu3 %v3352_v10  ;;  %v3412_v9 = vor.u32 %v3677_v4, %v3411_v2  ;;  %v3383_v10 = vld [vmem:[%s5407_s11 + $0x328] sm:$0xf]  ;;  %v1437_v4 = vperm.slane %v5382_v55, 2 }
 0x321   :  { %2085 = vmatmul.bf16.vlgmr.msra.gmra.mxu0 %v5085_v29  ;;  %2111 = vmatmul.bf16.vlgmr.msra.gmra.mxu1 %v5085_v29 }
 0x322   :  { %2133 = vmatpush.bf16.msrb.mxu0 %v3068_v15  ;;  %2159 = vmatpush.bf16.msrb.mxu1 %v3072_v16  ;;  %v3384_v15 = vor.u32 %v3670_v11, %v3383_v10  ;;  %v3355_v16 = vld [vmem:[%s5407_s11 + $0x2f0] sm:$0xf] }
 0x324   :  { %2145 = vmatpush.bf16.msrb.mxu2 %v3320_v21  ;;  %2171 = vmatpush.bf16.msrb.mxu3 %v3324_v22  ;;  %v3356_v21 = vor.u32 %v3663_v17, %v3355_v16  ;;  %v3327_v22 = vld [vmem:[%s5407_s11 + $0x2b8] sm:$0xf] }
 0x326   :  { %2134 = vmatpush.bf16.msrb.mxu0 %v3040_v27  ;;  %2160 = vmatpush.bf16.msrb.mxu1 %v3044_v28  ;;  %v3328_v27 = vor.u32 %v3656_v23, %v3327_v22  ;;  %v3299_v28 = vld [vmem:[%s5407_s11 + $0x280] sm:$0xf] }
 0x327   :  { %2098 = vmatmul.bf16.vlgmr.msra.gmra.mxu2 %v5125_v54  ;;  %2124 = vmatmul.bf16.vlgmr.msra.gmra.mxu3 %v5125_v54 }
 0x328   :  { %2146 = vmatpush.bf16.msrb.mxu2 %v3292_v35  ;;  %2172 = vmatpush.bf16.msrb.mxu3 %v3296_v36  ;;  %v3300_v35 = vor.u32 %v3649_v31, %v3299_v28  ;;  %v3271_v36 = vld [vmem:[%s5407_s11 + $0x248] sm:$0xf] }
 0x32a   :  { %2135 = vmatpush.bf16.msrb.mxu0 %v3012_v42  ;;  %2161 = vmatpush.bf16.msrb.mxu1 %v3016_v44  ;;  %v3272_v42 = vor.u32 %v3642_v38, %v3271_v36  ;;  %v3243_v44 = vld [vmem:[%s5407_s11 + $0x210] sm:$0xf] }
 0x32b   :  { %v3244_v47 = vor.u32 %v3635_v45, %v3243_v44 }
 0x32c   :  { %2147 = vmatpush.bf16.msrb.mxu2 %v3264_v49  ;;  %2173 = vmatpush.bf16.msrb.mxu3 %v3268_v50  ;;  %v3628_v49 = vld [vmem:[%s5407_s11 + $0x1f0] sm:$0xf0] }
 0x32d   :  { %v3216_v50 = vor.u32 %v3628_v49, %v3215_v48 }
 0x32e   :  { %2136 = vmatpush.bf16.msrb.mxu0 %v2984_v60  ;;  %2162 = vmatpush.bf16.msrb.mxu1 %v2988_v61 }
 0x330   :  { %2148 = vmatpush.bf16.msrb.mxu2 %v3236_v63  ;;  %2174 = vmatpush.bf16.msrb.mxu3 %v3240_v0 }
 0x331   :  { %2137 = vmatmul.bf16.vlgmr.msrb.gmra.mxu0 %v5085_v29  ;;  %2163 = vmatmul.bf16.vlgmr.msrb.gmra.mxu1 %v5085_v29 }
 0x332   :  { %2181 = vmatpush.bf16.msra.mxu0 %v3188_v62 }
 0x334   :  { %2149 = vmatpush.bf16.msrb.mxu2 %v3208_v5  ;;  %2175 = vmatpush.bf16.msrb.mxu3 %v3212_v6 }
 0x336   :  { %2182 = vmatpush.bf16.msra.mxu0 %v3160_v58  ;;  %v1438_v58 = vperm.slane %v5382_v55, 3 }
 0x337   :  { %2150 = vmatmul.bf16.vlgmr.msrb.gmra.mxu2 %v5125_v54  ;;  %2176 = vmatmul.bf16.vlgmr.msrb.gmra.mxu3 %v5125_v54 }
 0x338   :  { %2194 = vmatpush.bf16.msra.mxu2 %v3412_v9 }
 0x33a   :  { %2183 = vmatpush.bf16.msra.mxu0 %v3132_v12 }
 0x33c   :  { %2195 = vmatpush.bf16.msra.mxu2 %v3384_v15 }
 0x33e   :  { %2184 = vmatpush.bf16.msra.mxu0 %v3104_v18 }
 0x340   :  { %2196 = vmatpush.bf16.msra.mxu2 %v3356_v21 }
 0x342   :  { %2185 = vmatpush.bf16.msra.mxu0 %v3076_v24 }
 0x344   :  { %2197 = vmatpush.bf16.msra.mxu2 %v3328_v27 }
 0x346   :  { %2186 = vmatpush.bf16.msra.mxu0 %v3048_v32 }
 0x348   :  { %2198 = vmatpush.bf16.msra.mxu2 %v3300_v35 }
 0x34a   :  { %2187 = vmatpush.bf16.msra.mxu0 %v3020_v39  ;;  %v1439_v39 = vperm.slane %v5382_v55, 4 }
 0x34c   :  { %2199 = vmatpush.bf16.msra.mxu2 %v3272_v42 }
 0x34e   :  { %2188 = vmatpush.bf16.msra.mxu0 %v2992_v46 }
 0x350   :  { %2200 = vmatpush.bf16.msra.mxu2 %v3244_v47 }
 0x351   :  { %2189 = vmatmul.bf16.vlgmr.msra.gmra.mxu0 %v5085_v29  ;;  %v1435_v29 = vperm.slane %v5382_v55, 0 }
 0x354   :  { %2201 = vmatpush.bf16.msra.mxu2 %v3216_v50 }
 0x357   :  { %2202 = vmatmul.bf16.vlgmr.msra.gmra.mxu2 %v5125_v54  ;;  %v1436_v54 = vperm.slane %v5382_v55, 1 }
 0x38e   :  { %v2034_v52 = vpop.f32.mrf.mxu0  ;;  %v2060_v53 = vpop.f32.mrf.mxu1 }
 0x38f   :  { %v2035_v59 = vadd.f32 %v2034_v52, %v1435_v29  ;;  %v2061_v60 = vadd.f32 %v2060_v53, %v1436_v54 }
 0x396   :  { %v2036_v56 = vpop.f32.mrf.mxu0  ;;  %v2062_v57 = vpop.f32.mrf.mxu1 }
 0x39a   :  { %v2047_v61 = vpop.f32.mrf.mxu2  ;;  %v2073_v62 = vpop.f32.mrf.mxu3 }
 0x39b   :  { %v2048_v63 = vadd.f32 %v2047_v61, %v2035_v59  ;;  %v2074_v0 = vadd.f32 %v2073_v62, %v2061_v60 }
 0x39d   :  { %v3413_v1 = vmul.f32 -1.442695, %v2048_v63  ;;  %v3414_v51 = vmul.f32 -1.442695, %v2074_v0 }
 0x39e   :  { %v2086_v3 = vpop.f32.mrf.mxu0  ;;  %v2112_v43 = vpop.f32.mrf.mxu1 }
 0x39f   :  { %3683 = vpow2.f32 %v3413_v1  ;;  %v2087_v10 = vadd.f32 %v2086_v3, %v1437_v4  ;;  %v2113_v11 = vadd.f32 %v2112_v43, %v1438_v58 }
 0x3a0   :  { %3685 = vpow2.f32 %v3414_v51 }
 0x3a2   :  { %v2049_v30 = vpop.f32.mrf.mxu2  ;;  %v2075_v37 = vpop.f32.mrf.mxu3 }
 0x3a5   :  { %v3684_v2 = vpop.eup %3683 }
 0x3a6   :  { %v3686_v5 = vpop.eup %3685  ;;  %v2228_v6 = vadd.f32 1.0, %v3684_v2  ;;  %v2088_v7 = vpop.f32.mrf.mxu0 }
 0x3a7   :  { %v2114_v8 = vpop.f32.mrf.mxu1  ;;  %v2229_v9 = vadd.f32 1.0, %v3686_v5 }
 0x3a8   :  { %3687 = vrcp.f32 %v2228_v6  ;;  %v2246_v25 = vand.u32 2147483648, %v2228_v6  ;;  %v2244_v32 = vand.u32 2147483647, %v2228_v6  ;;  %vm2240_vm3 = vweird.f32 %v2228_v6 }
 0x3a9   :  { %3689 = vrcp.f32 %v2229_v9  ;;  %v2261_v33 = vand.u32 2147483648, %v2229_v9  ;;  %v2259_v35 = vand.u32 2147483647, %v2229_v9  ;;  %vm2255_vm5 = vweird.f32 %v2229_v9 }
 0x3aa   :  { %v2099_v12 = vpop.f32.mrf.mxu2  ;;  %v2125_v13 = vpop.f32.mrf.mxu3  ;;  %v2247_v42 = vor.u32 1.1754944e-38, %v2246_v25  ;;  %vm2245_vm6 = vcmp.eq.f32.partialorder %v2244_v32, 8.507059e+37 }
 0x3ab   :  { %v2100_v14 = vadd.f32 %v2099_v12, %v2087_v10  ;;  %v2126_v15 = vadd.f32 %v2125_v13, %v2113_v11  ;;  %v2262_v49 = vor.u32 1.1754944e-38, %v2261_v33  ;;  %vm2260_vm8 = vcmp.eq.f32.partialorder %v2259_v35, 8.507059e+37 }
 0x3ad   :  { %v3415_v16 = vmul.f32 -1.442695, %v2100_v14  ;;  %v3416_v17 = vmul.f32 -1.442695, %v2126_v15 }
 0x3ae   :  { %v3688_v18 = vpop.eup %3687  ;;  %v2138_v19 = vpop.f32.mrf.mxu0 }
 0x3af   :  { %v2164_v20 = vpop.f32.mrf.mxu1  ;;  %v3690_v21 = vpop.eup %3689  ;;  %v2236_v22 = vmul.f32 %v3688_v18, %v2228_v6  ;;  %3691 = vpow2.f32 %v3415_v16  ;;  %vm2241_vm1 = vweird.f32 %v3688_v18  ;;  %v2139_v54 = vadd.f32 %v2138_v19, %v1439_v39 }
 0x3b0   :  { %v2251_v23 = vmul.f32 %v3690_v21, %v2229_v9  ;;  %3693 = vpow2.f32 %v3416_v17  ;;  %vm2256_vm2 = vweird.f32 %v3690_v21  ;;  %vm2242_vm4 = vmor %vm2240_vm3, %vm2241_vm1  ;;  %v2165_v56 = vadd.f32 %v2164_v20, %v1440_v40 }
 0x3b1   :  { %v2237_v24 = vsub.f32 1.0, %v2236_v22  ;;  %vm2257_vm7 = vmor %vm2255_vm5, %vm2256_vm2 }
 0x3b2   :  { %v2252_v26 = vsub.f32 1.0, %v2251_v23  ;;  %v2101_v27 = vpop.f32.mrf.mxu2  ;;  %v2127_v28 = vpop.f32.mrf.mxu3 }
 0x3b3   :  { %v2238_v31 = vmul.f32 %v3688_v18, %v2237_v24 }
 0x3b4   :  { %v2253_v34 = vmul.f32 %v3690_v21, %v2252_v26 }
 0x3b5   :  { %v3692_v36 = vpop.eup %3691  ;;  %v2239_v38 = vadd.f32 %v3688_v18, %v2238_v31  ;;  %v1441_v31 = vperm.slane %v5382_v55, 6 }
 0x3b6   :  { %v3694_v41 = vpop.eup %3693  ;;  %v2254_v44 = vadd.f32 %v3690_v21, %v2253_v34  ;;  %v2230_v45 = vadd.f32 1.0, %v3692_v36  ;;  %v2140_v46 = vpop.f32.mrf.mxu0 }
 0x3b7   :  { %v2166_v47 = vpop.f32.mrf.mxu1  ;;  %v2243_v48 = vsel %vm2242_vm4, %v3688_v18, %v2239_v38  ;;  %v2231_v50 = vadd.f32 1.0, %v3694_v41 }
 0x3b8   :  { %v2248_v52 = vsel %vm2245_vm6, %v2247_v42, %v2243_v48  ;;  %v2258_v53 = vsel %vm2257_vm7, %v3690_v21, %v2254_v44  ;;  %3695 = vrcp.f32 %v2230_v45  ;;  %v2276_v30 = vand.u32 2147483648, %v2230_v45 }
 0x3b9   :  { %2340 = vst [vmem:[#allocation2] sm:$0xff] %v2248_v52  ;;  %v2263_v29 = vsel %vm2260_vm8, %v2262_v49, %v2258_v53  ;;  %3697 = vrcp.f32 %v2231_v50  ;;  %v2274_v58 = vand.u32 2147483647, %v2230_v45  ;;  %v2291_v5 = vand.u32 2147483648, %v2231_v50 }
 0x3ba   :  { %2341 = vst [vmem:[#allocation2 + $0x8] sm:$0xff] %v2263_v29  ;;  %v2151_v57 = vpop.f32.mrf.mxu2  ;;  %v2177_v60 = vpop.f32.mrf.mxu3  ;;  %v2289_v8 = vand.u32 2147483647, %v2231_v50  ;;  %vm2270_vm11 = vweird.f32 %v2230_v45  ;;  %v2277_v12 = vor.u32 1.1754944e-38, %v2276_v30  ;;  %vm2285_vm13 = vweird.f32 %v2231_v50 }
 0x3bb   :  { %v2152_v59 = vadd.f32 %v2151_v57, %v2139_v54  ;;  %v2178_v61 = vadd.f32 %v2177_v60, %v2165_v56  ;;  %vm2275_vm14 = vcmp.eq.f32.partialorder %v2274_v58, 8.507059e+37  ;;  %v2292_v16 = vor.u32 1.1754944e-38, %v2291_v5 }
 0x3bc   :  { %vm2290_vm1 = vcmp.eq.f32.partialorder %v2289_v8, 8.507059e+37 }
 0x3bd   :  { %v3417_v62 = vmul.f32 -1.442695, %v2152_v59  ;;  %v3418_v0 = vmul.f32 -1.442695, %v2178_v61 }
 0x3be   :  { %v3696_v63 = vpop.eup %3695 }
 0x3bf   :  { %v3698_v1 = vpop.eup %3697  ;;  %v2266_v51 = vmul.f32 %v3696_v63, %v2230_v45  ;;  %3699 = vpow2.f32 %v3417_v62  ;;  %vm2271_vm9 = vweird.f32 %v3696_v63 }
 0x3c0   :  { %v2281_v3 = vmul.f32 %v3698_v1, %v2231_v50  ;;  %3701 = vpow2.f32 %v3418_v0  ;;  %vm2286_vm10 = vweird.f32 %v3698_v1  ;;  %vm2272_vm12 = vmor %vm2270_vm11, %vm2271_vm9 }
 0x3c1   :  { %v2267_v43 = vsub.f32 1.0, %v2266_v51  ;;  %vm2287_vm15 = vmor %vm2285_vm13, %vm2286_vm10 }
 0x3c2   :  { %v2282_v37 = vsub.f32 1.0, %v2281_v3  ;;  %v2153_v2 = vpop.f32.mrf.mxu2  ;;  %v2179_v6 = vpop.f32.mrf.mxu3 }
 0x3c3   :  { %v2268_v4 = vmul.f32 %v3696_v63, %v2267_v43 }
 0x3c4   :  { %v2283_v7 = vmul.f32 %v3698_v1, %v2282_v37 }
 0x3c5   :  { %v3700_v9 = vpop.eup %3699  ;;  %v2269_v10 = vadd.f32 %v3696_v63, %v2268_v4 }
 0x3c6   :  { %v3702_v11 = vpop.eup %3701  ;;  %v2284_v13 = vadd.f32 %v3698_v1, %v2283_v7  ;;  %v2232_v14 = vadd.f32 1.0, %v3700_v9 }
 0x3c7   :  { %v2273_v15 = vsel %vm2272_vm12, %v3696_v63, %v2269_v10  ;;  %v2233_v17 = vadd.f32 1.0, %v3702_v11 }
 0x3c8   :  { %v2278_v18 = vsel %vm2275_vm14, %v2277_v12, %v2273_v15  ;;  %v2288_v19 = vsel %vm2287_vm15, %v3698_v1, %v2284_v13  ;;  %3703 = vrcp.f32 %v2232_v14  ;;  %v2306_v27 = vand.u32 2147483648, %v2232_v14 }
 0x3c9   :  { %2342 = vst [vmem:[#allocation2 + $0x10] sm:$0xff] %v2278_v18  ;;  %v2293_v20 = vsel %vm2290_vm1, %v2292_v16, %v2288_v19  ;;  %3705 = vrcp.f32 %v2233_v17  ;;  %v2304_v33 = vand.u32 2147483647, %v2232_v14  ;;  %v2321_v34 = vand.u32 2147483648, %v2233_v17 }
 0x3ca   :  { %2343 = vst [vmem:[#allocation2 + $0x18] sm:$0xff] %v2293_v20  ;;  %v2319_v38 = vand.u32 2147483647, %v2233_v17  ;;  %vm2300_vm4 = vweird.f32 %v2232_v14  ;;  %v2307_v40 = vor.u32 1.1754944e-38, %v2306_v27  ;;  %vm2315_vm6 = vweird.f32 %v2233_v17 }
 0x3cb   :  { %vm2305_vm7 = vcmp.eq.f32.partialorder %v2304_v33, 8.507059e+37  ;;  %v2322_v45 = vor.u32 1.1754944e-38, %v2321_v34 }
 0x3cc   :  { %vm2320_vm9 = vcmp.eq.f32.partialorder %v2319_v38, 8.507059e+37 }
 0x3ce   :  { %v2190_v21 = vpop.f32.mrf.mxu0  ;;  %v3704_v22 = vpop.eup %3703 }
 0x3cf   :  { %v3706_v23 = vpop.eup %3705  ;;  %v2296_v24 = vmul.f32 %v3704_v22, %v2232_v14  ;;  %vm2301_vm2 = vweird.f32 %v3704_v22  ;;  %v2191_v42 = vadd.f32 %v2190_v21, %v1441_v31 }
 0x3d0   :  { %v2311_v25 = vmul.f32 %v3706_v23, %v2233_v17  ;;  %vm2316_vm3 = vweird.f32 %v3706_v23  ;;  %vm2302_vm5 = vmor %vm2300_vm4, %vm2301_vm2 }
 0x3d1   :  { %v2297_v26 = vsub.f32 1.0, %v2296_v24  ;;  %vm2317_vm8 = vmor %vm2315_vm6, %vm2316_vm3 }
 0x3d2   :  { %v2312_v28 = vsub.f32 1.0, %v2311_v25 }
 0x3d3   :  { %v2298_v32 = vmul.f32 %v3704_v22, %v2297_v26 }
 0x3d4   :  { %v2313_v36 = vmul.f32 %v3706_v23, %v2312_v28 }
 0x3d5   :  { %v2299_v39 = vadd.f32 %v3704_v22, %v2298_v32 }
 0x3d6   :  { %v2192_v35 = vpop.f32.mrf.mxu0  ;;  %v2314_v41 = vadd.f32 %v3706_v23, %v2313_v36 }
 0x3d7   :  { %v2303_v44 = vsel %vm2302_vm5, %v3704_v22, %v2299_v39 }
 0x3d8   :  { %v2308_v46 = vsel %vm2305_vm7, %v2307_v40, %v2303_v44  ;;  %v2318_v47 = vsel %vm2317_vm8, %v3706_v23, %v2314_v41 }
 0x3d9   :  { %2344 = vst [vmem:[#allocation2 + $0x20] sm:$0xff] %v2308_v46  ;;  %v2323_v49 = vsel %vm2320_vm9, %v2322_v45, %v2318_v47 }
 0x3da   :  { %v2203_v55 = vpop.f32.mrf.mxu2  ;;  %2345 = vst [vmem:[#allocation2 + $0x28] sm:$0xff] %v2323_v49 }
 0x3db   :  { %v2204_v48 = vadd.f32 %v2203_v55, %v2191_v42 }
 0x3dd   :  { %v3419_v50 = vmul.f32 -1.442695, %v2204_v48 }
 0x3df   :  { %3707 = vpow2.f32 %v3419_v50 }
 0x3e2   :  { %v2205_v52 = vpop.f32.mrf.mxu2 }
 0x3e5   :  { %v3708_v53 = vpop.eup %3707 }
 0x3e6   :  { %v2234_v29 = vadd.f32 1.0, %v3708_v53 }
 0x3e8   :  { %3709 = vrcp.f32 %v2234_v29  ;;  %v2336_v59 = vand.u32 2147483648, %v2234_v29  ;;  %v2334_v61 = vand.u32 2147483647, %v2234_v29  ;;  %vm2330_vm11 = vweird.f32 %v2234_v29 }
 0x3ea   :  { %v2337_v63 = vor.u32 1.1754944e-38, %v2336_v59  ;;  %vm2335_vm13 = vcmp.eq.f32.partialorder %v2334_v61, 8.507059e+37 }
 0x3ee   :  { %v3710_v54 = vpop.eup %3709 }
 0x3ef   :  { %v2326_v56 = vmul.f32 %v3710_v54, %v2234_v29  ;;  %vm2331_vm10 = vweird.f32 %v3710_v54 }
 0x3f0   :  { %vm2332_vm12 = vmor %vm2330_vm11, %vm2331_vm10 }
 0x3f1   :  { %v2327_v57 = vsub.f32 1.0, %v2326_v56 }
 0x3f3   :  { %v2328_v60 = vmul.f32 %v3710_v54, %v2327_v57 }
 0x3f5   :  { %v2329_v62 = vadd.f32 %v3710_v54, %v2328_v60 }
 0x3f7   :  { %v2333_v0 = vsel %vm2332_vm12, %v3710_v54, %v2329_v62 }
 0x3f8   :  { %v2338_v1 = vsel %vm2335_vm13, %v2337_v63, %v2333_v0 }
 0x3f9   :  { %2346 = vst.msk [vmem:[#allocation2 + $0x30] sm:$0xff] %vm657_vm0, %v2338_v1 }
 0x3fa   :  { %2357 = dma.vmem_to_hbm [thread:$0]  %s2353_s14, 896, %s2355_s3, [#allocation3]  }
 0x3fb   :  { %3759 = dma.done.wait [#allocation3], 896  }
 0x3fc   :  { %3760 = vsyncadd [#allocation3], 4294966400 }
 0x3fd   :  { %3761 = dma.done.wait [#allocation5], 128  }
 0x3fe   :  { %3762 = vsyncadd [#allocation5], 4294967168 }
 0x3ff   :  { %2377 = vsyncpa [#allocation3], 1 }
 0x400   :  { %2378 = vsyncpa [#allocation5], 1 }

</bundles_post_ra>
